<compile_context>
chip_gen: v7x
topology: tpu7x:2x2x1
jax: 0.10.0
libtpu: 0.0.40
codegen_flags: <defaults>
</compile_context>

<pallas_src>
import functools

import jax
import jax.numpy as jnp
from jax.experimental import pallas as pl
from jax.experimental.pallas import tpu as pltpu


# ----------------------------------------------------------------------------
# Pallas kernel: one (batch, row-tile) step of the fused dual-stream conv stem
# ----------------------------------------------------------------------------
def _fused_stem_kernel(x_ref, w_ref, b_ref, o_ref, *, row_tile, width, cin2, cout):
    # x_ref : (1, row_tile+2, W+2, 2*Cin)  zero-padded bf16 halo tile
    #         (RGB and thermal packed along the channel axis)
    # w_ref : (18*Cin, 2*Cout)             block-diagonal bf16 weight
    #         row order = (dy, dx, packed_channel); [rgb -> first Cout cols]
    # b_ref : (1, 2*Cout)                  f32 bias            [rgb | thermal]
    # o_ref : (1, Cout, row_tile*W)        bf16 fused feature (lane-dense rows)
    rows = row_tile * width

    # In-kernel im2col: 9 shifted (row_tile, W, 2*Cin) views (all slices static
    # because the halo rows travel with the tile).  k order matches w_ref rows.
    cols = []
    for dy in range(3):
        for dx in range(3):
            slab = x_ref[0, dy:dy + row_tile, dx:dx + width, :]
            cols.append(slab.reshape(rows, cin2))
    patches = jnp.concatenate(cols, axis=-1)                # (rows, 18*Cin) bf16

    # Single MXU call covering both modalities, f32 accumulation.
    acc = jnp.dot(patches, w_ref[...], preferred_element_type=jnp.float32)
    acc = jnp.maximum(acc + b_ref[...], 0.0)                # bias + ReLU, both streams

    # Lane-dense orientation: rows on the lane axis, streams split on sublanes.
    acc_t = acc.T                                           # (2*Cout, rows) f32
    fused = acc_t[:cout, :] * acc_t[cout:, :]               # multiplicative fusion ("Mul")
    o_ref[0] = fused.astype(o_ref.dtype)


def _pick_row_tile(height, width, row_tile=None, target_rows=4096):
    """Pick a row tile th: th | H, th*W % 128 == 0 (lane-dense out store),
    ~target_rows patch rows per tile, and (if possible) >= 2 tiles so both
    v7x TensorCores get work at batch=1."""
    if row_tile is not None:
        assert height % row_tile == 0
        assert (row_tile * width) % 128 == 0 or row_tile == height
        return row_tile
    cands = sorted(t for t in range(1, height + 1)
                   if height % t == 0 and (t * width) % 128 == 0)
    if not cands:
        return height                                        # full-height fallback
    good = [t for t in cands if t * width <= target_rows]
    pool = good if good else cands[:1]
    par = [t for t in pool if height // t >= 2]              # keep both TCs busy (v7x)
    return max(par) if par else max(pool)


def fused_dual_conv3x3(x_rgb, x_t, w_bd, b_bd, *, cout, row_tile=None):
    """x_rgb, x_t: NHWC (B, H, W, Cin). Returns fused NCHW feature (B, Cout, H, W), bf16."""
    B, H, W, Cin = x_rgb.shape
    assert x_t.shape == x_rgb.shape
    C2 = 2 * Cin
    K = 9 * C2
    assert w_bd.shape == (K, 2 * cout) and b_bd.shape == (1, 2 * cout)

    th = _pick_row_tile(H, W, row_tile)
    nt = H // th
    Wp = W + 2

    # Pack modalities on channels, pad spatially, build overlapping halo tiles.
    x = jnp.concatenate([x_rgb, x_t], axis=-1).astype(jnp.bfloat16)   # (B, H, W, 2Cin)
    xp = jnp.pad(x, ((0, 0), (1, 1), (1, 1), (0, 0)))                 # (B, H+2, W+2, 2Cin)
    tiles = jnp.stack([xp[:, i * th:i * th + th + 2] for i in range(nt)],
                      axis=1)                                         # (B, nt, th+2, Wp, 2Cin)
    tiles = tiles.reshape(B * nt, th + 2, Wp, C2)

    kernel = functools.partial(_fused_stem_kernel,
                               row_tile=th, width=W, cin2=C2, cout=cout)
    grid = (B, nt)

    # Only the non-zero half of the block-diagonal matmul counts as useful work.
    flops = 2 * B * H * W * (9 * Cin) * cout * 2
    bytes_accessed = (B * nt * (th + 2) * Wp * C2 * 2      # bf16 halo tiles
                      + K * 2 * cout * 2 + 2 * cout * 4    # weights + bias
                      + B * H * W * cout * 2)              # bf16 fused output

    out = pl.pallas_call(
        kernel,
        out_shape=jax.ShapeDtypeStruct((B, cout, H * W), jnp.bfloat16),
        grid_spec=pltpu.PrefetchScalarGridSpec(
            num_scalar_prefetch=0,
            grid=grid,
            in_specs=[
                pl.BlockSpec((1, th + 2, Wp, C2),
                             lambda b, r, nt=nt: (b * nt + r, 0, 0, 0)),
                pl.BlockSpec((K, 2 * cout), lambda b, r: (0, 0)),
                pl.BlockSpec((1, 2 * cout), lambda b, r: (0, 0)),
            ],
            out_specs=pl.BlockSpec((1, cout, th * W), lambda b, r: (b, 0, r)),
        ),
        compiler_params=pltpu.CompilerParams(
            dimension_semantics=("parallel", "parallel"),
            # Per-step footprint is tile-bounded; 32 MiB is safe on v5e/v6e/v7x.
            # Raise toward 64-100 MiB on v5e/v6e for larger row tiles if desired.
            vmem_limit_bytes=32 * 1024 * 1024,
        ),
        cost_estimate=pl.CostEstimate(
            flops=flops, transcendentals=0, bytes_accessed=bytes_accessed),
    )(tiles, w_bd, b_bd)
    return out.reshape(B, cout, H, W)


# ----------------------------------------------------------------------------
# Concrete BaseDetectorMul with the abstract hooks filled by the Pallas kernel
# ----------------------------------------------------------------------------
class BaseDetectorMulPallas:
    """Dual-modality (RGB + thermal) conv stem with ReLU and multiplicative fusion.

    Inputs are NHWC; the fused feature is returned NCHW (B, Cout, H, W),
    matching PyTorch Conv2d output layout (and the kernel's lane-dense store)."""

    def __init__(self, in_channels=4, feat_channels=32, seed=0):
        self.fp16_enabled = False
        self.in_channels = in_channels
        self.feat_channels = feat_channels
        Cin, Cout = in_channels, feat_channels

        key = jax.random.PRNGKey(seed)
        k1, k2, k3, k4 = jax.random.split(key, 4)
        scale = 1.0 / jnp.sqrt(9.0 * Cin)
        # PyTorch Conv2d layout (Cout, Cin, kh, kw)
        w_rgb = jax.random.normal(k1, (Cout, Cin, 3, 3), jnp.float32) * scale
        w_t   = jax.random.normal(k2, (Cout, Cin, 3, 3), jnp.float32) * scale
        b_rgb = jax.random.normal(k3, (Cout,), jnp.float32) * 0.01
        b_t   = jax.random.normal(k4, (Cout,), jnp.float32) * 0.01

        # Block-diagonal weight, row order (dy, dx, packed_channel) so both
        # modalities (packed along Cin) share ONE MXU call:
        #   packed channel < Cin  -> rgb  -> first Cout columns
        #   packed channel >= Cin -> thermal -> last Cout columns
        w4 = jnp.zeros((3, 3, 2 * Cin, 2 * Cout), jnp.float32)
        w4 = w4.at[:, :, :Cin, :Cout].set(jnp.transpose(w_rgb, (2, 3, 1, 0)))
        w4 = w4.at[:, :, Cin:, Cout:].set(jnp.transpose(w_t, (2, 3, 1, 0)))
        self.w_bd = w4.reshape(9 * 2 * Cin, 2 * Cout).astype(jnp.bfloat16)
        self.b_bd = jnp.concatenate([b_rgb, b_t]).reshape(1, 2 * Cout).astype(jnp.float32)

    # --- properties mirroring the base class --------------------------------
    @property
    def with_neck(self):
        return hasattr(self, 'neck') and self.neck is not None

    @property
    def with_shared_head(self):
        return hasattr(self, 'shared_head') and self.shared_head is not None

    @property
    def with_bbox(self):
        return hasattr(self, 'bbox_head') and self.bbox_head is not None

    @property
    def with_mask(self):
        return hasattr(self, 'mask_head') and self.mask_head is not None

    # --- feature extraction (the Pallas hot path) ----------------------------
    def extract_feat(self, img, img_t, row_tile=None):
        """img, img_t: NHWC (B, H, W, Cin) -> fused NCHW feature (B, Cout, H, W), bf16."""
        assert img.ndim == 4 and img_t.shape == img.shape
        return fused_dual_conv3x3(img, img_t, self.w_bd, self.b_bd,
                                  cout=self.feat_channels, row_tile=row_tile)

    def extract_feats(self, imgs, imgs_t):
        assert isinstance(imgs, list)
        assert isinstance(imgs_t, list)
        for img_rgb, img_t in zip(imgs, imgs_t):
            yield self.extract_feat(img_rgb, img_t)

    # --- train / test hooks ---------------------------------------------------
    def forward_train(self, imgs, imgs_t, img_metas, **kwargs):
        # TODO(synk): loss heads (rpn/bbox/mask) are undefined in the abstract base class.
        raise NotImplementedError

    def simple_test(self, img, img_t, img_meta, **kwargs):
        return self.extract_feat(img, img_t)

    def aug_test(self, imgs, imgs_t, img_metas, **kwargs):
        # TODO(synk): test-time-augmentation merging is undefined in the abstract base class.
        raise NotImplementedError

    def init_weights(self, pretrained=None):
        if pretrained is not None:
            print('load model from: {}'.format(pretrained))

    def forward_test(self, imgs, imgs_t, img_metas, **kwargs):
        for var, name in [(imgs, 'imgs'), (imgs_t, 'imgs_t'), (img_metas, 'img_metas')]:
            if not isinstance(var, list):
                raise TypeError('{} must be a list, but got {}'.format(name, type(var)))
        num_augs = len(imgs)
        if num_augs != len(img_metas):
            raise ValueError('num of augmentations ({}) != num of image meta ({})'
                             .format(len(imgs), len(img_metas)))
        imgs_per_gpu = imgs[0].shape[0]
        assert imgs_per_gpu == 1
        if num_augs == 1:
            return self.simple_test(imgs[0], imgs_t[0], img_metas[0], **kwargs)
        else:
            return self.aug_test(imgs, imgs_t, img_metas, **kwargs)

    def forward(self, img, img_t, img_meta, return_loss=True, **kwargs):
        if return_loss:
            return self.forward_train(img, img_t, img_meta, **kwargs)
        else:
            return self.forward_test(img, img_t, img_meta, **kwargs)

    # TODO(synk): show_result depends on mmcv visualization and bbox heads; no Pallas equivalent.


# ----------------------------------------------------------------------------
# Pure-JAX reference (same bf16 cast + f32 accumulation + packed channels)
# ----------------------------------------------------------------------------
def _reference(det, img, img_t):
    B, H, W, C = img.shape
    C2 = 2 * C
    Cout = det.feat_channels

    x = jnp.concatenate([img, img_t], axis=-1).astype(jnp.bfloat16)
    xp = jnp.pad(x, ((0, 0), (1, 1), (1, 1), (0, 0)))
    cols = [xp[:, dy:dy + H, dx:dx + W, :] for dy in range(3) for dx in range(3)]
    p = jnp.concatenate(cols, axis=-1).reshape(B, H * W, 9 * C2)
    acc = jnp.dot(p, det.w_bd, preferred_element_type=jnp.float32) + det.b_bd
    acc = jnp.maximum(acc, 0.0)
    fused = acc[..., :Cout] * acc[..., Cout:]                 # (B, H*W, Cout)
    return jnp.transpose(fused, (0, 2, 1)).reshape(B, Cout, H, W)


if __name__ == "__main__":
    key = jax.random.PRNGKey(0)
    k1, k2 = jax.random.split(key)
    B, H, W, C = 2, 16, 16, 4
    Cout = 32
    img   = jax.random.normal(k1, (B, H, W, C), jnp.float32)   # NHWC
    img_t = jax.random.normal(k2, (B, H, W, C), jnp.float32)

    det = BaseDetectorMulPallas(in_channels=C, feat_channels=Cout, seed=0)
    ref = jax.block_until_ready(_reference(det, img, img_t))    # (B, Cout, H, W) f32

    # 1) training-style direct feature extraction (batch=2, auto row tile -> 2 tiles)
    feat = jax.block_until_ready(det.extract_feat(img, img_t))
    assert feat.shape == (B, Cout, H, W)
    assert jnp.allclose(feat.astype(jnp.float32), ref, rtol=2e-2, atol=2e-2)

    # 2) explicit full-height tile (exercises the single-row-tile path)
    feat2 = jax.block_until_ready(det.extract_feat(img, img_t, row_tile=16))
    assert jnp.allclose(feat2.astype(jnp.float32), ref, rtol=2e-2, atol=2e-2)

    # 3) inference dispatch: forward(return_loss=False) -> forward_test -> simple_test
    img_meta = [{"img_shape": (H, W, C)}]
    out = det.forward([img[:1]], [img_t[:1]], [img_meta], return_loss=False)
    out = jax.block_until_ready(out)
    assert out.shape == (1, Cout, H, W)
    assert jnp.allclose(out.astype(jnp.float32), ref[:1], rtol=2e-2, atol=2e-2)

    print("KERNEL_OK")
</pallas_src>

<mosaic_0001>
module attributes {stable_mosaic.version = 11 : i64} {
  func.func @_fused_stem_kernel(%arg0: i32, %arg1: i32, %arg2: memref<1x10x18x8xbf16, #tpu.memory_space<vmem>>, %arg3: memref<72x64xbf16, #tpu.memory_space<vmem>>, %arg4: memref<1x64xf32, #tpu.memory_space<vmem>>, %arg5: memref<1x32x128xbf16, #tpu.memory_space<vmem>>) attributes {dimension_semantics = [#tpu.dimension_semantics<parallel>, #tpu.dimension_semantics<parallel>], iteration_bounds = array<i64: 2, 2>, scalar_prefetch = 0 : i64, scratch_operands = 0 : i64, tpu.core_type = #tpu.core_type<tc>, window_params = [{transform_indices = @transform_0, window_bounds = array<i64: 1, 10, 18, 8>}, {pipeline_mode = #tpu.pipeline_mode<synchronous>, transform_indices = @transform_1, window_bounds = array<i64: 72, 64>}, {pipeline_mode = #tpu.pipeline_mode<synchronous>, transform_indices = @transform_2, window_bounds = array<i64: 1, 64>}, {transform_indices = @transform_3, window_bounds = array<i64: 1, 32, 128>}]} {
    %c0 = arith.constant 0 : index
    %c0_0 = arith.constant 0 : index
    %c0_1 = arith.constant 0 : index
    %c0_2 = arith.constant 0 : index
    %0 = vector.load %arg2[%c0, %c0_0, %c0_1, %c0_2] : memref<1x10x18x8xbf16, #tpu.memory_space<vmem>>, vector<1x8x16x8xbf16>
    %1 = vector.shape_cast %0 : vector<1x8x16x8xbf16> to vector<8x16x8xbf16>
    %2 = vector.shape_cast %1 : vector<8x16x8xbf16> to vector<128x8xbf16>
    %c0_3 = arith.constant 0 : index
    %c0_4 = arith.constant 0 : index
    %c1 = arith.constant 1 : index
    %c0_5 = arith.constant 0 : index
    %3 = vector.load %arg2[%c0_3, %c0_4, %c1, %c0_5] : memref<1x10x18x8xbf16, #tpu.memory_space<vmem>>, vector<1x8x16x8xbf16>
    %4 = vector.shape_cast %3 : vector<1x8x16x8xbf16> to vector<8x16x8xbf16>
    %5 = vector.shape_cast %4 : vector<8x16x8xbf16> to vector<128x8xbf16>
    %c0_6 = arith.constant 0 : index
    %c0_7 = arith.constant 0 : index
    %c2 = arith.constant 2 : index
    %c0_8 = arith.constant 0 : index
    %6 = vector.load %arg2[%c0_6, %c0_7, %c2, %c0_8] : memref<1x10x18x8xbf16, #tpu.memory_space<vmem>>, vector<1x8x16x8xbf16>
    %7 = vector.shape_cast %6 : vector<1x8x16x8xbf16> to vector<8x16x8xbf16>
    %8 = vector.shape_cast %7 : vector<8x16x8xbf16> to vector<128x8xbf16>
    %c0_9 = arith.constant 0 : index
    %c1_10 = arith.constant 1 : index
    %c0_11 = arith.constant 0 : index
    %c0_12 = arith.constant 0 : index
    %9 = vector.load %arg2[%c0_9, %c1_10, %c0_11, %c0_12] : memref<1x10x18x8xbf16, #tpu.memory_space<vmem>>, vector<1x8x16x8xbf16>
    %10 = vector.shape_cast %9 : vector<1x8x16x8xbf16> to vector<8x16x8xbf16>
    %11 = vector.shape_cast %10 : vector<8x16x8xbf16> to vector<128x8xbf16>
    %c0_13 = arith.constant 0 : index
    %c1_14 = arith.constant 1 : index
    %c1_15 = arith.constant 1 : index
    %c0_16 = arith.constant 0 : index
    %12 = vector.load %arg2[%c0_13, %c1_14, %c1_15, %c0_16] : memref<1x10x18x8xbf16, #tpu.memory_space<vmem>>, vector<1x8x16x8xbf16>
    %13 = vector.shape_cast %12 : vector<1x8x16x8xbf16> to vector<8x16x8xbf16>
    %14 = vector.shape_cast %13 : vector<8x16x8xbf16> to vector<128x8xbf16>
    %c0_17 = arith.constant 0 : index
    %c1_18 = arith.constant 1 : index
    %c2_19 = arith.constant 2 : index
    %c0_20 = arith.constant 0 : index
    %15 = vector.load %arg2[%c0_17, %c1_18, %c2_19, %c0_20] : memref<1x10x18x8xbf16, #tpu.memory_space<vmem>>, vector<1x8x16x8xbf16>
    %16 = vector.shape_cast %15 : vector<1x8x16x8xbf16> to vector<8x16x8xbf16>
    %17 = vector.shape_cast %16 : vector<8x16x8xbf16> to vector<128x8xbf16>
    %c0_21 = arith.constant 0 : index
    %c2_22 = arith.constant 2 : index
    %c0_23 = arith.constant 0 : index
    %c0_24 = arith.constant 0 : index
    %18 = vector.load %arg2[%c0_21, %c2_22, %c0_23, %c0_24] : memref<1x10x18x8xbf16, #tpu.memory_space<vmem>>, vector<1x8x16x8xbf16>
    %19 = vector.shape_cast %18 : vector<1x8x16x8xbf16> to vector<8x16x8xbf16>
    %20 = vector.shape_cast %19 : vector<8x16x8xbf16> to vector<128x8xbf16>
    %c0_25 = arith.constant 0 : index
    %c2_26 = arith.constant 2 : index
    %c1_27 = arith.constant 1 : index
    %c0_28 = arith.constant 0 : index
    %21 = vector.load %arg2[%c0_25, %c2_26, %c1_27, %c0_28] : memref<1x10x18x8xbf16, #tpu.memory_space<vmem>>, vector<1x8x16x8xbf16>
    %22 = vector.shape_cast %21 : vector<1x8x16x8xbf16> to vector<8x16x8xbf16>
    %23 = vector.shape_cast %22 : vector<8x16x8xbf16> to vector<128x8xbf16>
    %c0_29 = arith.constant 0 : index
    %c2_30 = arith.constant 2 : index
    %c2_31 = arith.constant 2 : index
    %c0_32 = arith.constant 0 : index
    %24 = vector.load %arg2[%c0_29, %c2_30, %c2_31, %c0_32] : memref<1x10x18x8xbf16, #tpu.memory_space<vmem>>, vector<1x8x16x8xbf16>
    %25 = vector.shape_cast %24 : vector<1x8x16x8xbf16> to vector<8x16x8xbf16>
    %26 = vector.shape_cast %25 : vector<8x16x8xbf16> to vector<128x8xbf16>
    %27 = tpu.concatenate %2, %5, %8, %11, %14, %17, %20, %23, %26 in 1 : vector<128x8xbf16>, vector<128x8xbf16>, vector<128x8xbf16>, vector<128x8xbf16>, vector<128x8xbf16>, vector<128x8xbf16>, vector<128x8xbf16>, vector<128x8xbf16>, vector<128x8xbf16> -> vector<128x72xbf16>
    %c0_33 = arith.constant 0 : index
    %c0_34 = arith.constant 0 : index
    %28 = vector.load %arg3[%c0_33, %c0_34] : memref<72x64xbf16, #tpu.memory_space<vmem>>, vector<72x64xbf16>
    %cst = arith.constant dense<0.000000e+00> : vector<128x64xf32>
    %29 = tpu.matmul %27, %28, %cst {dimension_numbers = #tpu.dot_dimension_numbers<[1], [0], [0], [1], [0, 0, 1, 1], [], []>} : vector<128x72xbf16>, vector<72x64xbf16>, vector<128x64xf32> -> vector<128x64xf32>
    %c0_35 = arith.constant 0 : index
    %c0_36 = arith.constant 0 : index
    %30 = vector.load %arg4[%c0_35, %c0_36] : memref<1x64xf32, #tpu.memory_space<vmem>>, vector<1x64xf32>
    %31 = vector.broadcast %30 : vector<1x64xf32> to vector<128x64xf32>
    %32 = arith.addf %29, %31 : vector<128x64xf32>
    %cst_37 = arith.constant 0.000000e+00 : f32
    %33 = vector.broadcast %cst_37 : f32 to vector<128x64xf32>
    %34 = arith.maximumf %32, %33 : vector<128x64xf32>
    %35 = tpu.transpose %34, [1, 0] : vector<128x64xf32> -> vector<64x128xf32>
    %36 = vector.extract_strided_slice %35 {offsets = [0, 0], sizes = [32, 128], strides = [1, 1]} : vector<64x128xf32> to vector<32x128xf32>
    %37 = vector.extract_strided_slice %35 {offsets = [32, 0], sizes = [32, 128], strides = [1, 1]} : vector<64x128xf32> to vector<32x128xf32>
    %38 = arith.mulf %36, %37 : vector<32x128xf32>
    %39 = arith.truncf %38 : vector<32x128xf32> to vector<32x128xbf16>
    %c0_38 = arith.constant 0 : index
    %c0_39 = arith.constant 0 : index
    %c0_40 = arith.constant 0 : index
    %40 = vector.load %arg5[%c0_38, %c0_39, %c0_40] : memref<1x32x128xbf16, #tpu.memory_space<vmem>>, vector<1x32x128xbf16>
    %41 = vector.shape_cast %40 : vector<1x32x128xbf16> to vector<32x128xbf16>
    %42 = vector.shape_cast %39 : vector<32x128xbf16> to vector<1x32x128xbf16>
    tpu.vector_store %arg5[%c0_38, %c0_39, %c0_40], %42 {strides = array<i32>} : memref<1x32x128xbf16, #tpu.memory_space<vmem>>, vector<1x32x128xbf16>,
    return
  }
  func.func @transform_0(%arg0: i32, %arg1: i32) -> (i32, i32, i32, i32) {
    %c2_i32 = arith.constant 2 : i32
    %0 = arith.muli %arg0, %c2_i32 : i32
    %1 = arith.addi %0, %arg1 : i32
    %c0_i32 = arith.constant 0 : i32
    %c0_i32_0 = arith.constant 0 : i32
    %c0_i32_1 = arith.constant 0 : i32
    %c0_i32_2 = arith.constant 0 : i32
    return %1, %c0_i32, %c0_i32_0, %c0_i32_1 : i32, i32, i32, i32
  }
  func.func @transform_1(%arg0: i32, %arg1: i32) -> (i32, i32) {
    %c0_i32 = arith.constant 0 : i32
    %c0_i32_0 = arith.constant 0 : i32
    %c0_i32_1 = arith.constant 0 : i32
    return %c0_i32, %c0_i32_0 : i32, i32
  }
  func.func @transform_2(%arg0: i32, %arg1: i32) -> (i32, i32) {
    %c0_i32 = arith.constant 0 : i32
    %c0_i32_0 = arith.constant 0 : i32
    %c0_i32_1 = arith.constant 0 : i32
    return %c0_i32, %c0_i32_0 : i32, i32
  }
  func.func @transform_3(%arg0: i32, %arg1: i32) -> (i32, i32, i32) {
    %c0_i32 = arith.constant 0 : i32
    %c0_i32_0 = arith.constant 0 : i32
    return %arg0, %c0_i32, %arg1 : i32, i32, i32
  }
}

</mosaic_0001>

<bundles_post_ra>
// kernel: tpu_custom_call.1
= control target key start
LH: loop header
LB: loop body
LE: loop exit
PB: predicated region body
PF: predicated region fallthrough
CT: control target
= control target key end

     0   :  { %8 = vsyncpa [#allocation3], 0  ;;  %s3333_s0 = inlined_call_operand.vmem [shape: bf16[4,10,18,8], index: 0, kind: input, shape index: {}]   ;;  %s3334_s1 = inlined_call_operand.vmem [shape: bf16[72,64], index: 1, kind: input, shape index: {}]   ;;  %s3335_s2 = inlined_call_operand.vmem [shape: f32[1,64], index: 2, kind: input, shape index: {}]   ;;  %s3336_s3 = inlined_call_operand.hbm [shape: bf16[2,32,256], index: 3, kind: output, shape index: {}]  }
   0x1   :  { %10 = vsyncpa [#allocation3 + $0x1], 0  ;;  %s2460_s12 = smov 0   ;;  %s2462_s13 = smov 0  }
   0x2   :  { %s2464_s14 = smov 0   ;;  %s2466_s15 = smov 0  }
   0x3   :  { %s2468_s16 = smov 0   ;;  %s2470_s17 = smov 0  }
   0x4   :  { %s2472_s18 = smov 0   ;;  %s2474_s19 = smov 0  }
   0x5 LB: > { %s1953_s20 = sadd.s32 4294967295, %s2427_s19   ;;  %s1954_s21 = sadd.s32 4294967294, %s2427_s19   ;;  %s2427_s19 = sphi %s2474_s19, %s16_s19   ;;  %s2423_s18 = sphi %s2472_s18, %s3349_s18   ;;  %s2419_s17 = sphi %s2470_s17, %s3348_s17   ;;  %s2415_s16 = sphi %s2468_s16, %s3347_s16   ;;  %s2411_s15 = sphi %s2466_s15, %s3346_s15   ;;  %s2407_s14 = sphi %s2464_s14, %s3345_s14   ;;  %s2403_s13 = sphi %s2462_s13, %s3344_s13   ;;  %s2399_s12 = sphi %s2460_s12, %s3343_s12  }
   0x6   : > { %s25_s22 = sadd.s32 1, %s2419_s17  ;;  %s28_s23 = sadd.s32 1, %s2423_s18 }
   0x7   : > { %p26_p0 = scmp.ge.s32.totalorder %s25_s22, 2  ;;  %p119_p1 = scmp.ne.s32.totalorder %s2407_s14, %s2403_s13 }
   0x8   : > { %p120_p2 = scmp.eq.s32.totalorder %s1953_s20, 3  ;;  %p125_p5 = scmp.ne.s32.totalorder %s2403_s13, %s2399_s12 }
   0x9   : > { %s3351_s22 = smov (%p26_p0, %s25_s22), 0  ;;  %s3353_s23 = smov (!%p26_p0, %s28_s23), %s2423_s18 }
   0xa   : > { %s105_s24 = ssub.s32 %s2419_s17, %s3351_s22  ;;  %p2511_p3 = por %p120_p2, %p119_p1 }
   0xb   : > { %p30_p4 = scmp.ge.s32.totalorder %s3353_s23, 2  ;;  %p126_p6 = scmp.eq.s32.totalorder %s1954_s21, 3 }
   0xc   : > { %p1959_p7 = scmp.ge.s32.totalorder %s2427_s19, 1  ;;  %p162_p9 = scmp.lt.s32.totalorder %s2427_s19, 5 }
   0xd   : > { %s3355_s23 = smov (%p30_p4, %s3353_s23), 0  ;;  %p2520_p8 = por %p126_p6, %p125_p5 }
   0xe   : > { %s104_s27 = ssub.s32 %s2423_s18, %s3355_s23  ;;  %s109_s28 = sadd.s32 1, %s2407_s14 }
   0xf   : > { %s106_s29 = sor.u32 %s105_s24, %s104_s27  ;;  %p163_p10 = pnand %p1959_p7, %p162_p9 }
  0x10   : > { %p107_p11 = scmp.eq.s32.totalorder %s106_s29, 0  ;;  %s1961_s4 = sshll.u32 (!%p163_p10), %s2415_s16, 1  ;;  %vm449_vm0 = vcmask (!%p163_p10), 1042432   ;;  %vm450_vm1 = vcmask (!%p163_p10), 1046532   ;;  %vm222_vm3 = vsmask.f32 (!%p163_p10), 3328 }
  0x11   : > { %166 = sbr.rel (%p163_p10) target bundleno = 645 (0x285), region = 32  ;;  %s189_s5 = sadd.s32 (!%p163_p10), %s2411_s15, %s1961_s4  ;;  %vm2580_vm2 = vmor (!%p163_p10), %vm449_vm0, %vm450_vm1  ;;  %vm223_vm4 = vsmask.f32 (!%p163_p10), 7440  ;;  %vm1486_vm6 = vcmask (!%p163_p10), 64512   ;;  %vm1511_vm7 = vcmask (!%p163_p10), 130048   ;;  %vm1528_vm8 = vcmask (!%p163_p10), 195584  }
  0x12   : > { %s2529_s30 = scalar_select %p107_p11, %s2407_s14, %s109_s28  }
  0x13   : > { %p190_p12 = scmp.lt.s32.totalorder (!%p163_p10), %s189_s5, 3  ;;  %s2429_s10 = smov (!%p163_p10), 24   ;;  %vm2627_vm5 = vmor (!%p163_p10), %vm222_vm3, %vm223_vm4  ;;  %vm1545_vm9 = vcmask (!%p163_p10), 261120   ;;  %vm1562_vm10 = vcmask (!%p163_p10), 326656   ;;  %vm1579_vm11 = vcmask (!%p163_p10), 392192   ;;  %vm1690_vm12 = vcmask (!%p163_p10), 1043456  }
  0x14   : > { %s2430_s11 = smov (!%p163_p10), 48   ;;  %s2431_s20 = smov (!%p163_p10), 40   ;;  %vm1596_vm13 = vcmask (!%p163_p10), 457728   ;;  %vm1613_vm14 = vcmask (!%p163_p10), 523264   ;;  %vm1673_vm15 = vcmask (!%p163_p10), 588800  }
  0x15   : > { %s2432_s21 = smov (!%p163_p10), 16   ;;  %s2433_s24 = smov (!%p163_p10), 8  }
  0x16   : > { %s2435_s28 = smov (!%p163_p10), 56   ;;  %s2436_s29 = smov (!%p163_p10), 64  }
  0x17   : > { %s2142_s4 = sshll.u32 (!%p163_p10), %s2415_s16, 3 }
  0x18   : > { %s3357_s5 = smov (!%p190_p12, %s189_s5), 3 }
  0x19   : > { %s2212_s6 = smul.u32 120, %s3357_s5  ;;  %s2434_s5 = smov 32  }
  0x1b   : > { %s2536_s9 = scalar_lea.vmem %s3333_s0, %s2212_s6 }
  0x1c   : > { %v1973_v0 = vld [vmem:[%s2536_s9 + $0x18] sm:$0xf]  ;;  %v2540_v1 = vld [vmem:[%s2536_s9 + $0x1c] sm:$0xf]  ;;  %v1971_v2 = vld [vmem:[%s2536_s9 + $0xc] sm:$0xf] }
  0x1d   : > { %v567_v3 = vshll.u32 %v2540_v1, 16  ;;  %v571_v4 = vshrl.u32 %v2540_v1, 16  ;;  %v2076_v5 = vcombine.low %v1973_v0, %v2540_v1  ;;  %v558_v6 = vshrl.u32 %v1973_v0, 16  ;;  %v2547_v7 = vld [vmem:[%s2536_s9 + $0x10] sm:$0xf] }
  0x1e   : > { %v561_v8 = vshll.u32 %v1973_v0, 16  ;;  %v543_v9 = vshll.u32 %v2547_v7, 16  ;;  %v547_v10 = vshrl.u32 %v2547_v7, 16  ;;  %v2075_v11 = vcombine.low %v1971_v2, %v2547_v7  ;;  %v2013_v12 = vld [vmem:[%s2536_s9 + $0x24] sm:$0xf] }
  0x1f   : > { %v2553_v13 = vrot.slane %v571_v4, 4  ;;  %1264 = vrot.lane.b32.xlu1 %v2076_v5, %s2429_s10  ;;  %v560_v14 = vrot.slane %v558_v6, 4  ;;  %v534_v15 = vshrl.u32 %v1971_v2, 16  ;;  %v537_v16 = vshll.u32 %v1971_v2, 16  ;;  %v2557_v17 = vld [vmem:[%s2536_s9 + $0x28] sm:$0xf] }
  0x20   : > { %v563_v18 = vrot.slane %v561_v8, 5  ;;  %v2559_v19 = vrot.slane %v547_v10, 4  ;;  %1262 = vrot.lane.b32.xlu0 %v2075_v11, %s2429_s10  ;;  %v863_v20 = vshrl.u32 %v2013_v12, 16  ;;  %v866_v21 = vshll.u32 %v2013_v12, 16  ;;  %v2011_v22 = vld [vmem:[%s2536_s9 + $0x18] sm:$0xf] }
  0x21   : > { %v536_v23 = vrot.slane %v534_v15, 4  ;;  %v539_v24 = vrot.slane %v537_v16, 5  ;;  %v876_v25 = vshrl.u32 %v2557_v17, 16  ;;  %v2100_v26 = vcombine.low %v2013_v12, %v2557_v17  ;;  %v2566_v27 = vld [vmem:[%s2536_s9 + $0x1c] sm:$0xf] }
  0x22   : > { %v564_v28 = vor.u32 %v563_v18, %v560_v14  ;;  %v2568_v29 = vrot.slane %v863_v20, 4  ;;  %v2570_v30 = vrot.slane %v866_v21, 5  ;;  %v839_v31 = vshrl.u32 %v2011_v22, 16  ;;  %v2573_v32 = vld [vmem:[%s2536_s9 + $0x14] sm:$0x1] }
  0x23   : > { %v540_v33 = vor.u32 %v539_v24, %v536_v23  ;;  %1392 = vrot.lane.b32.xlu1 %v2100_v26, %s2430_s11  ;;  %v842_v34 = vshll.u32 %v2011_v22, 16  ;;  %v852_v35 = vshrl.u32 %v2566_v27, 16  ;;  %v2099_v36 = vcombine.low %v2011_v22, %v2566_v27  ;;  %v1995_v38 = vld [vmem:[%s2536_s9 + $0xc] sm:$0xe]  ;;  %v199_v39 = vld [vmem:[%s2536_s9 + $0x4] sm:$0xf] }
  0x24   : > { %v2586_v40 = vrot.slane %v564_v28, 4  ;;  %v2588_v41 = vrot.slane %v839_v31, 4  ;;  %v2003_v42 = vrot.slane %v1995_v38, 9  ;;  %v759_v43 = vrot.slane %v2547_v7, 5  ;;  %v214_v44 = vld [vmem:[%s2536_s9 + $0x8] sm:$0x1] }
  0x25   : > { %v2592_v45 = vrot.slane %v540_v33, 4  ;;  %v2594_v46 = vrot.slane %v842_v34, 5  ;;  %1390 = vrot.lane.b32.xlu0 %v2099_v36, %s2430_s11  ;;  %v762_v47 = vrot.slane %v2573_v32, 5  ;;  %v417_v48 = vld [vmem:[%s2536_s9] sm:$0xe]  ;;  %v454_v49 = vrot.slane %v199_v39, 5 }
  0x26   : > { %v760_v50 = vsel %vm2580_vm2, %v2003_v42, %v759_v43  ;;  %v761_v51 = vrot.slane %v759_v43, 4  ;;  %v1963_v52 = vrot.slane %v417_v48, 9  ;;  %v457_v53 = vrot.slane %v214_v44, 5  ;;  %v201_v54 = vld [vmem:[%s2536_s9 + $0x10] sm:$0xf] }
  0x27   : > { %v456_v55 = vrot.slane %v454_v49, 4  ;;  %v215_v56 = vld [vmem:[%s2536_s9 + $0x14] sm:$0x1]  ;;  %v418_v57 = vld [vmem:[%s2536_s9 + $0xc] sm:$0xe]  ;;  %v461_v58 = vrot.slane %v201_v54, 5  ;;  %v869_v59 = vor.u32 %v2570_v30, %v2568_v29  ;;  %v845_v60 = vor.u32 %v2594_v46, %v2588_v41 }
  0x28   : > { %v763_v61 = vsel %vm2580_vm2, %v761_v51, %v762_v47  ;;  %v455_v62 = vsel %vm2580_vm2, %v1963_v52, %v454_v49  ;;  %v1964_v63 = vrot.slane %v418_v57, 9  ;;  %v464_v0 = vrot.slane %v215_v56, 5  ;;  %v198_v2 = vld [vmem:[%s2536_s9] sm:$0xf]  ;;  %v1996_v10 = vld [vmem:[%s2536_s9 + $0x18] sm:$0xe] }
  0x29   : > { %v2091_v4 = vcombine.low %v760_v50, %v763_v61  ;;  %v458_v5 = vsel %vm2580_vm2, %v456_v55, %v457_v53  ;;  %v463_v6 = vrot.slane %v461_v58, 4  ;;  %v226_v8 = vshrl.u32 %v198_v2, 16  ;;  %v1988_v16 = vld [vmem:[%s2536_s9 + $0x20] sm:$0x1]  ;;  %v200_v23 = vld [vmem:[%s2536_s9 + $0xc] sm:$0xf] }
  0x2a   : > { %v2067_v11 = vcombine.low %v455_v62, %v458_v5  ;;  %v462_v12 = vsel %vm2580_vm2, %v1964_v63, %v461_v58  ;;  %v229_v14 = vshll.u32 %v198_v2, 16  ;;  %v235_v15 = vshll.u32 %v199_v39, 16  ;;  %v2693_v46 = vld [vmem:[%s2536_s9 + $0x1c] sm:$0xf] }
  0x2b   : > { %1342 = vrot.lane.b32.xlu0 %v2091_v4, %s2431_s20  ;;  %v465_v18 = vsel %vm2580_vm2, %v463_v6, %v464_v0  ;;  %v228_v20 = vrot.slane %v226_v8, 4  ;;  %v239_v21 = vshrl.u32 %v199_v39, 16  ;;  %v245_v22 = vshll.u32 %v214_v44, 16  ;;  %v2317_v39 = vld [vmem:[%s3334_s1 + $0x20] ss:$0 sps:$4 sm:$0xff]  }
  0x2c   : > { %1214 = vrot.lane.b32.xlu1 %v2067_v11, %s2432_s21  ;;  %v2068_v24 = vcombine.low %v462_v12, %v465_v18  ;;  %v231_v26 = vrot.slane %v229_v14, 5  ;;  %v237_v28 = vrot.slane %v235_v15, 5  ;;  %v2004_v31 = vrot.slane %v1996_v10, 9 }
  0x2d   : > { %v241_v33 = vrot.slane %v239_v21, 4  ;;  %v247_v34 = vrot.slane %v245_v22, 5  ;;  %v766_v36 = vrot.slane %v2540_v1, 5  ;;  %v769_v38 = vrot.slane %v1988_v16, 5  ;;  %v2654_v21 = vld [vmem:[%s2536_s9 + $0x2c] sm:$0x1] }
  0x2e   : > { %v232_v42 = vor.u32 %v231_v26, %v228_v20  ;;  %v250_v43 = vshrl.u32 %v200_v23, 16  ;;  %v253_v47 = vshll.u32 %v200_v23, 16  ;;  %v259_v48 = vshll.u32 %v201_v54, 16  ;;  %v2311_v23 = vld [vmem:[%s3334_s1] sm:$0xff]  }
  0x2f   : > { %v242_v44 = vor.u32 %v241_v33, %v237_v28  ;;  %v767_v49 = vsel %vm2580_vm2, %v2004_v31, %v766_v36  ;;  %v768_v50 = vrot.slane %v766_v36, 4  ;;  %v263_v51 = vshrl.u32 %v201_v54, 16  ;;  %v2674_v26 = vld [vmem:[%s2536_s9 + $0x20] sm:$0x1]  ;;  %2174 = vmatprep.subr.bf16.mxu0 %v2311_v23  ;;  %2200 = vmatprep.subr.bf16.mxu1 %v2311_v23 }
  0x30   : > { %1216 = vrot.lane.b32.xlu1 %v2068_v24, %s2432_s21  ;;  %v233_v52 = vrot.slane %v232_v42, 4  ;;  %v252_v53 = vrot.slane %v250_v43, 4  ;;  %v255_v55 = vrot.slane %v253_v47, 5  ;;  %v261_v57 = vrot.slane %v259_v48, 5  ;;  %2175 = vmatpush3.bf16.msra.mxu0 %v2311_v23  ;;  %v2314_v48 = vld [vmem:[%s3334_s1 + $0x10] sm:$0xff]  }
  0x31   : > { %v243_v58 = vrot.slane %v242_v44, 4  ;;  %v770_v61 = vsel %vm2580_vm2, %v768_v50, %v769_v38  ;;  %v265_v62 = vrot.slane %v263_v51, 4  ;;  %v269_v63 = vshll.u32 %v215_v56, 16  ;;  %v2703_v50 = vld [vmem:[%s2536_s9 + $0x20] sm:$0x1]  ;;  %2205 = vmatpush3.bf16.msra.mxu1 %v2311_v23 }
  0x32   : > { %v238_v0 = vsel %vm2627_vm5, %v233_v52, %v237_v28  ;;  %v2092_v2 = vcombine.low %v767_v49, %v770_v61  ;;  %v256_v4 = vor.u32 %v255_v55, %v252_v53  ;;  %v569_v54 = vrot.slane %v567_v3, 5  ;;  %v202_v28 = vld [vmem:[%s2536_s9 + $0x18] sm:$0xf]  ;;  %v2036_v23 = vld [vmem:[%s2536_s9 + $0x24] sm:$0xe] }
  0x33   : > { %v248_v5 = vsel %vm2627_vm5, %v243_v58, %v247_v34  ;;  %v266_v6 = vor.u32 %v265_v62, %v261_v57  ;;  %v271_v8 = vrot.slane %v269_v63, 5  ;;  %v577_v10 = vshll.u32 %v1988_v16, 16  ;;  %v2313_v34 = vld [vmem:[%s3334_s1 + $0x8] sm:$0xff]   ;;  %v2035_v58 = vld [vmem:[%s2536_s9 + $0x18] sm:$0xe] }
  0x34   : > { %v2059_v11 = vcombine.low %v238_v0, %v248_v5  ;;  %1344 = vrot.lane.b32.xlu1 %v2092_v2, %s2431_s20  ;;  %v257_v12 = vrot.slane %v256_v4, 4  ;;  %v570_v56 = vsel %vm2627_vm5, %v2586_v40, %v569_v54  ;;  %v574_v14 = vor.u32 %v2553_v13, %v569_v54  ;;  %2176 = vmatprep.subr.bf16.mxu0 %v2313_v34  ;;  %v204_v2 = vld [vmem:[%s2536_s9 + $0x24] sm:$0xf] }
  0x35   : > { %v267_v15 = vrot.slane %v266_v6, 4  ;;  %v579_v1 = vrot.slane %v577_v10, 5  ;;  %v545_v3 = vrot.slane %v543_v9, 5  ;;  %v553_v18 = vshll.u32 %v2573_v32, 16  ;;  %2201 = vmatprep.subr.bf16.mxu1 %v2313_v34  ;;  %2177 = vmatpush3.bf16.msra.mxu0 %v2313_v34 }
  0x36   : > { %1174 = vrot.lane.b32.xlu0 %v2059_v11, %s2433_s24  ;;  %v262_v16 = vsel %vm2627_vm5, %v257_v12, %v261_v57  ;;  %v575_v20 = vrot.slane %v574_v14, 4  ;;  %v870_v13 = vrot.slane %v869_v59, 4  ;;  %v872_v7 = vshll.u32 %v2557_v17, 16  ;;  %2178 = vmatprep.subr.bf16.mxu0 %v2314_v48 }
  0x37   : > { %v272_v9 = vsel %vm2627_vm5, %v267_v15, %v271_v8  ;;  %v546_v32 = vsel %vm2627_vm5, %v2592_v45, %v545_v3  ;;  %v550_v40 = vor.u32 %v2559_v19, %v545_v3  ;;  %v555_v22 = vrot.slane %v553_v18, 5  ;;  %v2315_v8 = vld [vmem:[%s3334_s1 + $0x18] sm:$0xff]   ;;  %2206 = vmatpush3.bf16.msra.mxu1 %v2313_v34  ;;  %v205_v3 = vld [vmem:[%s2536_s9 + $0x28] sm:$0xf] }
  0x38   : > { %v2060_v24 = vcombine.low %v262_v16, %v272_v9  ;;  %v580_v29 = vsel %vm2627_vm5, %v575_v20, %v579_v1  ;;  %v874_v30 = vrot.slane %v872_v7, 5  ;;  %v878_v59 = vrot.slane %v876_v25, 4  ;;  %2202 = vmatprep.subr.bf16.mxu1 %v2314_v48  ;;  %v217_v7 = vld [vmem:[%s2536_s9 + $0x2c] sm:$0x1] }
  0x39   : > { %v2084_v45 = vcombine.low %v570_v56, %v580_v29  ;;  %v551_v31 = vrot.slane %v550_v40, 4  ;;  %v882_v19 = vshll.u32 %v2654_v21, 16  ;;  %v2681_v33 = vrot.slane %v845_v60, 4  ;;  %2179 = vmatpush3.bf16.msra.mxu0 %v2314_v48 }
  0x3a   : > { %1176 = vrot.lane.b32.xlu0 %v2060_v24, %s2433_s24  ;;  %v875_v25 = vsel %vm2627_vm5, %v870_v13, %v874_v30  ;;  %v879_v36 = vor.u32 %v878_v59, %v874_v30  ;;  %v848_v38 = vshll.u32 %v2566_v27, 16  ;;  %v854_v41 = vrot.slane %v852_v35, 4  ;;  %2180 = vmatprep.subr.bf16.mxu0 %v2315_v8 }
  0x3b   : > { %1304 = vrot.lane.b32.xlu1 %v2084_v45, %s2434_s5  ;;  %v556_v60 = vsel %vm2627_vm5, %v551_v31, %v555_v22  ;;  %v884_v42 = vrot.slane %v882_v19, 5  ;;  %v858_v43 = vshll.u32 %v2674_v26, 16  ;;  %v274_v47 = vshrl.u32 %v202_v28, 16  ;;  %2207 = vmatpush3.bf16.msra.mxu1 %v2314_v48  ;;  %v420_v19 = vld [vmem:[%s2536_s9 + $0x24] sm:$0xe] }
  0x3c   : > { %v2083_v35 = vcombine.low %v546_v32, %v556_v60  ;;  %v880_v44 = vrot.slane %v879_v36, 4  ;;  %v850_v49 = vrot.slane %v848_v38, 5  ;;  %v277_v51 = vshll.u32 %v202_v28, 16  ;;  %2203 = vmatprep.subr.bf16.mxu1 %v2315_v8  ;;  %v419_v38 = vld [vmem:[%s2536_s9 + $0x18] sm:$0xe] }
  0x3d   : > { %v860_v52 = vrot.slane %v858_v43, 5  ;;  %v276_v53 = vrot.slane %v274_v47, 4  ;;  %v283_v55 = vshll.u32 %v2693_v46, 16  ;;  %v287_v57 = vshrl.u32 %v2693_v46, 16  ;;  %2181 = vmatpush3.bf16.msra.mxu0 %v2315_v8 }
  0x3e   : > { %1302 = vrot.lane.b32.xlu0 %v2083_v35, %s2434_s5  ;;  %v885_v61 = vsel %vm2627_vm5, %v880_v44, %v884_v42  ;;  %v851_v62 = vsel %vm2627_vm5, %v2681_v33, %v850_v49  ;;  %v855_v63 = vor.u32 %v854_v41, %v850_v49  ;;  %v279_v0 = vrot.slane %v277_v51, 5  ;;  %v2742_v49 = vld [vmem:[%s2536_s9 + $0x30] sm:$0xf]  ;;  %2210 = vmatprep.subr.msk.bf16.mxu0 %vm1690_vm12, %v2317_v39 }
  0x3f   : > { %v2108_v4 = vcombine.low %v875_v25, %v885_v61  ;;  %v285_v54 = vrot.slane %v283_v55, 5  ;;  %v289_v5 = vrot.slane %v287_v57, 4  ;;  %v293_v6 = vshll.u32 %v2703_v50, 16  ;;  %2208 = vmatpush3.bf16.msra.mxu1 %v2315_v8  ;;  %v2765_v8 = vld [vmem:[%s2536_s9 + $0x28] sm:$0xf] }
  0x40   : > { %v856_v10 = vrot.slane %v855_v63, 4  ;;  %v280_v11 = vor.u32 %v279_v0, %v276_v53  ;;  %v2043_v12 = vrot.slane %v2035_v58, 9  ;;  %v1064_v56 = vrot.slane %v2566_v27, 5  ;;  %v1978_v0 = vld [vmem:[%s2536_s9 + $0x34] sm:$0xf]  ;;  %2211 = vmatprep.subr.msk.bf16.mxu1 %vm1690_vm12, %v2317_v39 }
  0x41   : > { %1432 = vrot.lane.b32.xlu1 %v2108_v4, %s2435_s28  ;;  %v290_v14 = vor.u32 %v289_v5, %v285_v54  ;;  %v295_v15 = vrot.slane %v293_v6, 5  ;;  %v1067_v1 = vrot.slane %v2674_v26, 5  ;;  %v298_v18 = vshrl.u32 %v204_v2, 16  ;;  %v1975_v4 = vld [vmem:[%s2536_s9 + $0x24] sm:$0xf] }
  0x42   : > { %v861_v16 = vsel %vm2627_vm5, %v856_v10, %v860_v52  ;;  %v281_v20 = vrot.slane %v280_v11, 4  ;;  %v1065_v13 = vsel %vm2580_vm2, %v2043_v12, %v1064_v56  ;;  %v1066_v27 = vrot.slane %v1064_v56, 4 }
  0x43   : > { %v2107_v9 = vcombine.low %v851_v62, %v861_v16  ;;  %v291_v32 = vrot.slane %v290_v14, 4  ;;  %v300_v40 = vrot.slane %v298_v18, 4  ;;  %v301_v22 = vshll.u32 %v204_v2, 16 }
  0x44   : > { %v286_v24 = vsel %vm2627_vm5, %v281_v20, %v285_v54  ;;  %v1068_v29 = vsel %vm2580_vm2, %v1066_v27, %v1067_v1  ;;  %v307_v30 = vshll.u32 %v205_v3, 16  ;;  %v311_v59 = vshrl.u32 %v205_v3, 16  ;;  %v2777_v27 = vld [vmem:[%s2536_s9 + $0x2c] sm:$0x1] }
  0x45   : > { %1430 = vrot.lane.b32.xlu0 %v2107_v9, %s2435_s28  ;;  %v296_v26 = vsel %vm2627_vm5, %v291_v32, %v295_v15  ;;  %v2115_v28 = vcombine.low %v1065_v13, %v1068_v29  ;;  %v303_v45 = vrot.slane %v301_v22, 5  ;;  %v317_v31 = vshll.u32 %v217_v7, 16  ;;  %v1998_v22 = vld [vmem:[%s2536_s9 + $0x30] sm:$0xe] }
  0x46   : > { %v2061_v33 = vcombine.low %v286_v24, %v296_v26  ;;  %v309_v34 = vrot.slane %v307_v30, 5  ;;  %v313_v25 = vrot.slane %v311_v59, 4  ;;  %v2044_v36 = vrot.slane %v2036_v23, 9 }
  0x47   : > { %v304_v41 = vor.u32 %v303_v45, %v300_v40  ;;  %v319_v60 = vrot.slane %v317_v31, 5  ;;  %v1071_v42 = vrot.slane %v2557_v17, 5  ;;  %v1074_v43 = vrot.slane %v2654_v21, 5  ;;  %v1997_v31 = vld [vmem:[%s2536_s9 + $0x24] sm:$0xe] }
  0x48   : > { %1178 = vrot.lane.b32.xlu1 %v2061_v33, %s2433_s24  ;;  %v314_v47 = vor.u32 %v313_v25, %v309_v34  ;;  %v1966_v48 = vrot.slane %v420_v19, 9  ;;  %v475_v35 = vrot.slane %v205_v3, 5  ;;  %v478_v44 = vrot.slane %v217_v7, 5  ;;  %v1990_v3 = vld [vmem:[%s2536_s9 + $0x38] sm:$0x1] }
  0x49   : > { %1470 = vrot.lane.b32.xlu0 %v2115_v28, %s2436_s29  ;;  %v305_v51 = vrot.slane %v304_v41, 4  ;;  %v1072_v17 = vsel %vm2580_vm2, %v2044_v36, %v1071_v42  ;;  %v1073_v52 = vrot.slane %v1071_v42, 4  ;;  %v1965_v21 = vrot.slane %v419_v38, 9 }
  0x4a   : > { %v315_v53 = vrot.slane %v314_v47, 4  ;;  %v476_v55 = vsel %vm2580_vm2, %v1966_v48, %v475_v35  ;;  %v477_v57 = vrot.slane %v475_v35, 4  ;;  %v468_v58 = vrot.slane %v2693_v46, 5  ;;  %v2786_v35 = vld [vmem:[%s2536_s9 + $0x3c] sm:$0xf] }
  0x4b   : > { %v310_v61 = vsel %vm2627_vm5, %v305_v51, %v309_v34  ;;  %v1075_v62 = vsel %vm2580_vm2, %v1073_v52, %v1074_v43  ;;  %v471_v63 = vrot.slane %v2703_v50, 5  ;;  %v606_v2 = vshrl.u32 %v2742_v49, 16 }
  0x4c   : > { %v320_v54 = vsel %vm2627_vm5, %v315_v53, %v319_v60  ;;  %v2116_v5 = vcombine.low %v1072_v17, %v1075_v62  ;;  %v479_v46 = vsel %vm2580_vm2, %v477_v57, %v478_v44  ;;  %v469_v6 = vsel %vm2580_vm2, %v1965_v21, %v468_v58 }
  0x4d   : > { %v2062_v10 = vcombine.low %v310_v61, %v320_v54  ;;  %v2070_v50 = vcombine.low %v476_v55, %v479_v46  ;;  %v470_v11 = vrot.slane %v468_v58, 4  ;;  %v608_v12 = vrot.slane %v606_v2, 4  ;;  %v2803_v61 = vld [vmem:[%s2536_s9 + $0x40] sm:$0xf]  ;;  %v2813_v46 = vld [vmem:[%s2536_s9 + $0x34] sm:$0xf] }
  0x4e   : > { %1472 = vrot.lane.b32.xlu0 %v2116_v5, %s2436_s29  ;;  %v609_v56 = vshll.u32 %v2742_v49, 16  ;;  %v619_v14 = vshrl.u32 %v1978_v0, 16  ;;  %v2078_v15 = vcombine.low %v2742_v49, %v1978_v0  ;;  %v582_v1 = vshrl.u32 %v1975_v4, 16 }
  0x4f   : > { %1180 = vrot.lane.b32.xlu1 %v2062_v10, %s2433_s24  ;;  %v472_v18 = vsel %vm2580_vm2, %v470_v11, %v471_v63  ;;  %v585_v16 = vshll.u32 %v1975_v4, 16  ;;  %v595_v20 = vshrl.u32 %v2765_v8, 16  ;;  %v2077_v13 = vcombine.low %v1975_v4, %v2765_v8 }
  0x50   : > { %v2069_v7 = vcombine.low %v469_v6, %v472_v18  ;;  %v611_v9 = vrot.slane %v609_v56, 5  ;;  %v584_v32 = vrot.slane %v582_v1, 4  ;;  %v615_v40 = vshll.u32 %v1978_v0, 16 }
  0x51   : > { %v587_v23 = vrot.slane %v585_v16, 5  ;;  %v621_v24 = vrot.slane %v619_v14, 4  ;;  %v625_v29 = vshll.u32 %v1990_v3, 16  ;;  %v591_v30 = vshll.u32 %v2765_v8, 16 }
  0x52   : > { %1218 = vrot.lane.b32.xlu0 %v2069_v7, %s2432_s21  ;;  %v612_v59 = vor.u32 %v611_v9, %v608_v12  ;;  %v617_v26 = vrot.slane %v615_v40, 5  ;;  %v597_v28 = vrot.slane %v595_v20, 4  ;;  %v601_v45 = vshll.u32 %v2777_v27, 16  ;;  %v2828_v20 = vld [vmem:[%s2536_s9 + $0x38] sm:$0x1] }
  0x53   : > { %1220 = vrot.lane.b32.xlu1 %v2070_v50, %s2432_s21  ;;  %v627_v19 = vrot.slane %v625_v29, 5  ;;  %v588_v33 = vor.u32 %v587_v23, %v584_v32  ;;  %v593_v34 = vrot.slane %v591_v30, 5  ;;  %v2006_v25 = vrot.slane %v1998_v22, 9  ;;  %v206_v32 = vld [vmem:[%s2536_s9 + $0x30] sm:$0xf] }
  0x54   : > { %v613_v36 = vrot.slane %v612_v59, 4  ;;  %v622_v38 = vor.u32 %v621_v24, %v617_v26  ;;  %v603_v41 = vrot.slane %v601_v45, 5  ;;  %v780_v60 = vrot.slane %v1978_v0, 5  ;;  %v2015_v0 = vld [vmem:[%s2536_s9 + $0x30] sm:$0xf] }
  0x55   : > { %v589_v42 = vrot.slane %v588_v33, 4  ;;  %v598_v43 = vor.u32 %v597_v28, %v593_v34  ;;  %v783_v47 = vrot.slane %v1990_v3, 5  ;;  %v2005_v48 = vrot.slane %v1997_v31, 9  ;;  %v2837_v28 = vld [vmem:[%s2536_s9 + $0x34] sm:$0xf] }
  0x56   : > { %1266 = vrot.lane.b32.xlu0 %v2077_v13, %s2429_s10  ;;  %v618_v44 = vsel %vm2627_vm5, %v613_v36, %v617_v26  ;;  %v623_v49 = vrot.slane %v622_v38, 4  ;;  %v781_v51 = vsel %vm2580_vm2, %v2006_v25, %v780_v60  ;;  %v782_v17 = vrot.slane %v780_v60, 4  ;;  %v2037_v60 = vld [vmem:[%s2536_s9 + $0x30] sm:$0xe] }
  0x57   : > { %1268 = vrot.lane.b32.xlu1 %v2078_v15, %s2429_s10  ;;  %v594_v52 = vsel %vm2627_vm5, %v589_v42, %v593_v34  ;;  %v599_v21 = vrot.slane %v598_v43, 4  ;;  %v773_v53 = vrot.slane %v2765_v8, 5  ;;  %v776_v55 = vrot.slane %v2777_v27, 5  ;;  %v2820_v15 = vld [vmem:[%s2536_s9 + $0x44] sm:$0x1] }
  0x58   : > { %v628_v57 = vsel %vm2627_vm5, %v623_v49, %v627_v19  ;;  %v784_v58 = vsel %vm2580_vm2, %v782_v17, %v783_v47  ;;  %v911_v62 = vshrl.u32 %v2786_v35, 16  ;;  %v914_v63 = vshll.u32 %v2786_v35, 16  ;;  %v2841_v19 = vld [vmem:[%s2536_s9 + $0x38] sm:$0x1] }
  0x59   : > { %v2086_v2 = vcombine.low %v618_v44, %v628_v57  ;;  %v604_v4 = vsel %vm2627_vm5, %v599_v21, %v603_v41  ;;  %v2094_v54 = vcombine.low %v781_v51, %v784_v58  ;;  %v774_v5 = vsel %vm2580_vm2, %v2005_v48, %v773_v53 }
  0x5a   : > { %v2085_v6 = vcombine.low %v594_v52, %v604_v4  ;;  %v775_v8 = vrot.slane %v773_v53, 4  ;;  %v913_v10 = vrot.slane %v911_v62, 4  ;;  %v916_v50 = vrot.slane %v914_v63, 5 }
  0x5b   : > { %1308 = vrot.lane.b32.xlu1 %v2086_v2, %s2434_s5  ;;  %v924_v11 = vshrl.u32 %v2803_v61, 16  ;;  %v2102_v12 = vcombine.low %v2786_v35, %v2803_v61  ;;  %v887_v56 = vshrl.u32 %v2015_v0, 16  ;;  %v890_v14 = vshll.u32 %v2015_v0, 16 }
  0x5c   : > { %1306 = vrot.lane.b32.xlu0 %v2085_v6, %s2434_s5  ;;  %v777_v1 = vsel %vm2580_vm2, %v775_v8, %v776_v55  ;;  %v900_v3 = vshrl.u32 %v2813_v46, 16  ;;  %v2101_v18 = vcombine.low %v2015_v0, %v2813_v46  ;;  %v917_v16 = vor.u32 %v916_v50, %v913_v10  ;;  %v2854_v55 = vld [vmem:[%s2536_s9 + $0x3c] sm:$0xf]  ;;  %v2860_v0 = vld [vmem:[%s2536_s9 + $0x40] sm:$0xf] }
  0x5d   : > { %v2093_v13 = vcombine.low %v774_v5, %v777_v1  ;;  %v889_v27 = vrot.slane %v887_v56, 4  ;;  %v892_v7 = vrot.slane %v890_v14, 5  ;;  %v920_v9 = vshll.u32 %v2803_v61, 16  ;;  %v219_v6 = vld [vmem:[%s2536_s9 + $0x44] sm:$0x1] }
  0x5e   : > { %v918_v40 = vrot.slane %v917_v16, 4  ;;  %v926_v22 = vrot.slane %v924_v11, 4  ;;  %v930_v23 = vshll.u32 %v2820_v15, 16  ;;  %v896_v24 = vshll.u32 %v2813_v46, 16  ;;  %v2038_v1 = vld [vmem:[%s2536_s9 + $0x3c] sm:$0xe] }
  0x5f   : > { %1348 = vrot.lane.b32.xlu1 %v2094_v54, %s2431_s20  ;;  %v922_v29 = vrot.slane %v920_v9, 5  ;;  %v893_v30 = vor.u32 %v892_v7, %v889_v27  ;;  %v902_v59 = vrot.slane %v900_v3, 4  ;;  %v906_v26 = vshll.u32 %v2828_v20, 16 }
  0x60   : > { %1346 = vrot.lane.b32.xlu0 %v2093_v13, %s2431_s20  ;;  %v932_v45 = vrot.slane %v930_v23, 5  ;;  %v898_v31 = vrot.slane %v896_v24, 5  ;;  %v322_v33 = vshrl.u32 %v206_v32, 16  ;;  %v325_v34 = vshll.u32 %v206_v32, 16  ;;  %v422_v32 = vld [vmem:[%s2536_s9 + $0x3c] sm:$0xe] }
  0x61   : > { %v923_v25 = vsel %vm2627_vm5, %v918_v40, %v922_v29  ;;  %v927_v36 = vor.u32 %v926_v22, %v922_v29  ;;  %v894_v38 = vrot.slane %v893_v30, 4  ;;  %v908_v41 = vrot.slane %v906_v26, 5  ;;  %v421_v29 = vld [vmem:[%s2536_s9 + $0x30] sm:$0xe] }
  0x62   : > { %v903_v42 = vor.u32 %v902_v59, %v898_v31  ;;  %v324_v43 = vrot.slane %v322_v33, 4  ;;  %v327_v47 = vrot.slane %v325_v34, 5  ;;  %v331_v48 = vshll.u32 %v2837_v28, 16 }
  0x63   : > { %1396 = vrot.lane.b32.xlu1 %v2102_v12, %s2430_s11  ;;  %v928_v35 = vrot.slane %v927_v36, 4  ;;  %v899_v44 = vsel %vm2627_vm5, %v894_v38, %v898_v31  ;;  %v335_v49 = vshrl.u32 %v2837_v28, 16  ;;  %v341_v51 = vshll.u32 %v2841_v19, 16  ;;  %v2888_v36 = vld [vmem:[%s2536_s9 + $0x48] sm:$0xf] }
  0x64   : > { %1394 = vrot.lane.b32.xlu0 %v2101_v18, %s2430_s11  ;;  %v904_v17 = vrot.slane %v903_v42, 4  ;;  %v328_v52 = vor.u32 %v327_v47, %v324_v43  ;;  %v333_v21 = vrot.slane %v331_v48, 5  ;;  %v2045_v53 = vrot.slane %v2037_v60, 9 }
  0x65   : > { %v933_v57 = vsel %vm2627_vm5, %v928_v35, %v932_v45  ;;  %v337_v58 = vrot.slane %v335_v49, 4  ;;  %v343_v62 = vrot.slane %v341_v51, 5  ;;  %v1078_v63 = vrot.slane %v2813_v46, 5  ;;  %v1982_v49 = vld [vmem:[%s2536_s9 + $0x4c] sm:$0xf] }
  0x66   : > { %v2110_v2 = vcombine.low %v923_v25, %v933_v57  ;;  %v909_v4 = vsel %vm2627_vm5, %v904_v17, %v908_v41  ;;  %v329_v54 = vrot.slane %v328_v52, 4  ;;  %v1081_v5 = vrot.slane %v2828_v20, 5  ;;  %v1979_v17 = vld [vmem:[%s2536_s9 + $0x3c] sm:$0xf]  ;;  %v2911_v57 = vld [vmem:[%s2536_s9 + $0x40] sm:$0xf] }
  0x67   : > { %v2109_v8 = vcombine.low %v899_v44, %v909_v4  ;;  %v338_v10 = vor.u32 %v337_v58, %v333_v21  ;;  %v1079_v50 = vsel %vm2580_vm2, %v2045_v53, %v1078_v63  ;;  %v1080_v11 = vrot.slane %v1078_v63, 4 }
  0x68   : > { %1436 = vrot.lane.b32.xlu1 %v2110_v2, %s2435_s28  ;;  %v334_v46 = vsel %vm2627_vm5, %v329_v54, %v333_v21  ;;  %v346_v12 = vshrl.u32 %v2854_v55, 16  ;;  %v349_v56 = vshll.u32 %v2854_v55, 16  ;;  %v355_v14 = vshll.u32 %v2860_v0, 16 }
  0x69   : > { %1434 = vrot.lane.b32.xlu0 %v2109_v8, %s2435_s28  ;;  %v339_v3 = vrot.slane %v338_v10, 4  ;;  %v1082_v18 = vsel %vm2580_vm2, %v1080_v11, %v1081_v5  ;;  %v359_v16 = vshrl.u32 %v2860_v0, 16  ;;  %v365_v20 = vshll.u32 %v219_v6, 16 }
  0x6a   : > { %v2117_v13 = vcombine.low %v1079_v50, %v1082_v18  ;;  %v348_v27 = vrot.slane %v346_v12, 4  ;;  %v351_v7 = vrot.slane %v349_v56, 5  ;;  %v357_v9 = vrot.slane %v355_v14, 5 }
  0x6b   : > { %v344_v40 = vsel %vm2627_vm5, %v339_v3, %v343_v62  ;;  %v361_v22 = vrot.slane %v359_v16, 4  ;;  %v367_v23 = vrot.slane %v365_v20, 5  ;;  %v2046_v24 = vrot.slane %v2038_v1, 9  ;;  %v2000_v3 = vld [vmem:[%s2536_s9 + $0x48] sm:$0xe] }
  0x6c   : > { %v2063_v30 = vcombine.low %v334_v46, %v344_v40  ;;  %v352_v59 = vor.u32 %v351_v7, %v348_v27  ;;  %v1085_v26 = vrot.slane %v2803_v61, 5  ;;  %v1088_v45 = vrot.slane %v2820_v15, 5  ;;  %v2923_v46 = vld [vmem:[%s2536_s9 + $0x44] sm:$0x1]  ;;  %v1999_v40 = vld [vmem:[%s2536_s9 + $0x3c] sm:$0xe] }
  0x6d   : > { %1474 = vrot.lane.b32.xlu0 %v2117_v13, %s2436_s29  ;;  %v362_v31 = vor.u32 %v361_v22, %v357_v9  ;;  %v1968_v33 = vrot.slane %v422_v32, 9  ;;  %v489_v34 = vrot.slane %v2860_v0, 5  ;;  %v492_v25 = vrot.slane %v219_v6, 5  ;;  %v1992_v6 = vld [vmem:[%s2536_s9 + $0x50] sm:$0x1] }
  0x6e   : > { %1182 = vrot.lane.b32.xlu1 %v2063_v30, %s2433_s24  ;;  %v353_v38 = vrot.slane %v352_v59, 4  ;;  %v1086_v41 = vsel %vm2580_vm2, %v2046_v24, %v1085_v26  ;;  %v1087_v61 = vrot.slane %v1085_v26, 4  ;;  %v1967_v15 = vrot.slane %v421_v29, 9 }
  0x6f   : > { %v363_v60 = vrot.slane %v362_v31, 4  ;;  %v490_v42 = vsel %vm2580_vm2, %v1968_v33, %v489_v34  ;;  %v491_v43 = vrot.slane %v489_v34, 4  ;;  %v482_v47 = vrot.slane %v2837_v28, 5 }
  0x70   : > { %v358_v48 = vsel %vm2627_vm5, %v353_v38, %v357_v9  ;;  %v1089_v35 = vsel %vm2580_vm2, %v1087_v61, %v1088_v45  ;;  %v485_v44 = vrot.slane %v2841_v19, 5  ;;  %v654_v51 = vshrl.u32 %v2888_v36, 16 }
  0x71   : > { %v368_v52 = vsel %vm2627_vm5, %v363_v60, %v367_v23  ;;  %v2118_v21 = vcombine.low %v1086_v41, %v1089_v35  ;;  %v493_v28 = vsel %vm2580_vm2, %v491_v43, %v492_v25  ;;  %v483_v53 = vsel %vm2580_vm2, %v1967_v15, %v482_v47 }
  0x72   : > { %v2064_v58 = vcombine.low %v358_v48, %v368_v52  ;;  %v2072_v19 = vcombine.low %v490_v42, %v493_v28  ;;  %v484_v62 = vrot.slane %v482_v47, 4  ;;  %v656_v63 = vrot.slane %v654_v51, 4 }
  0x73   : > { %1476 = vrot.lane.b32.xlu0 %v2118_v21, %s2436_s29  ;;  %v657_v2 = vshll.u32 %v2888_v36, 16  ;;  %v667_v4 = vshrl.u32 %v1982_v49, 16  ;;  %v2080_v54 = vcombine.low %v2888_v36, %v1982_v49  ;;  %v630_v5 = vshrl.u32 %v1979_v17, 16  ;;  %v2932_v36 = vld [vmem:[%s2536_s9 + $0x54] sm:$0xf] }
  0x74   : > { %1184 = vrot.lane.b32.xlu1 %v2064_v58, %s2433_s24  ;;  %v486_v8 = vsel %vm2580_vm2, %v484_v62, %v485_v44  ;;  %v633_v10 = vshll.u32 %v1979_v17, 16  ;;  %v643_v50 = vshrl.u32 %v2911_v57, 16  ;;  %v2079_v11 = vcombine.low %v1979_v17, %v2911_v57  ;;  %v2949_v44 = vld [vmem:[%s2536_s9 + $0x58] sm:$0xf]  ;;  %v2019_v17 = vld [vmem:[%s2536_s9 + $0x48] sm:$0xf] }
  0x75   : > { %v2071_v12 = vcombine.low %v483_v53, %v486_v8  ;;  %v659_v56 = vrot.slane %v657_v2, 5  ;;  %v632_v14 = vrot.slane %v630_v5, 4  ;;  %v663_v1 = vshll.u32 %v1982_v49, 16 }
  0x76   : > { %v635_v18 = vrot.slane %v633_v10, 5  ;;  %v669_v16 = vrot.slane %v667_v4, 4  ;;  %v673_v20 = vshll.u32 %v1992_v6, 16  ;;  %v639_v13 = vshll.u32 %v2911_v57, 16 }
  0x77   : > { %1222 = vrot.lane.b32.xlu0 %v2071_v12, %s2432_s21  ;;  %v660_v27 = vor.u32 %v659_v56, %v656_v63  ;;  %v665_v7 = vrot.slane %v663_v1, 5  ;;  %v645_v9 = vrot.slane %v643_v50, 4  ;;  %v649_v32 = vshll.u32 %v2923_v46, 16 }
  0x78   : > { %1224 = vrot.lane.b32.xlu1 %v2072_v19, %s2432_s21  ;;  %v675_v22 = vrot.slane %v673_v20, 5  ;;  %v636_v23 = vor.u32 %v635_v18, %v632_v14  ;;  %v641_v24 = vrot.slane %v639_v13, 5  ;;  %v2008_v29 = vrot.slane %v2000_v3, 9  ;;  %v2978_v3 = vld [vmem:[%s2536_s9 + $0x48] sm:$0xf] }
  0x79   : > { %v661_v30 = vrot.slane %v660_v27, 4  ;;  %v670_v59 = vor.u32 %v669_v16, %v665_v7  ;;  %v651_v26 = vrot.slane %v649_v32, 5  ;;  %v794_v45 = vrot.slane %v1982_v49, 5 }
  0x7a   : > { %v637_v31 = vrot.slane %v636_v23, 4  ;;  %v646_v33 = vor.u32 %v645_v9, %v641_v24  ;;  %v797_v34 = vrot.slane %v1992_v6, 5  ;;  %v2007_v25 = vrot.slane %v1999_v40, 9  ;;  %v2966_v6 = vld [vmem:[%s2536_s9 + $0x5c] sm:$0x1] }
  0x7b   : > { %1270 = vrot.lane.b32.xlu0 %v2079_v11, %s2429_s10  ;;  %v666_v38 = vsel %vm2627_vm5, %v661_v30, %v665_v7  ;;  %v671_v41 = vrot.slane %v670_v59, 4  ;;  %v795_v61 = vsel %vm2580_vm2, %v2008_v29, %v794_v45  ;;  %v796_v15 = vrot.slane %v794_v45, 4  ;;  %v2985_v40 = vld [vmem:[%s2536_s9 + $0x4c] sm:$0xf] }
  0x7c   : > { %1272 = vrot.lane.b32.xlu1 %v2080_v54, %s2429_s10  ;;  %v642_v60 = vsel %vm2627_vm5, %v637_v31, %v641_v24  ;;  %v647_v42 = vrot.slane %v646_v33, 4  ;;  %v787_v43 = vrot.slane %v2911_v57, 5  ;;  %v790_v47 = vrot.slane %v2923_v46, 5  ;;  %v2959_v57 = vld [vmem:[%s2536_s9 + $0x4c] sm:$0xf] }
  0x7d   : > { %v676_v48 = vsel %vm2627_vm5, %v671_v41, %v675_v22  ;;  %v798_v35 = vsel %vm2580_vm2, %v796_v15, %v797_v34  ;;  %v959_v49 = vshrl.u32 %v2932_v36, 16  ;;  %v962_v51 = vshll.u32 %v2932_v36, 16  ;;  %v2974_v46 = vld [vmem:[%s2536_s9 + $0x50] sm:$0x1]  ;;  %v2039_v33 = vld [vmem:[%s2536_s9 + $0x48] sm:$0xe] }
  0x7e   : > { %v2088_v52 = vcombine.low %v666_v38, %v676_v48  ;;  %v652_v21 = vsel %vm2627_vm5, %v647_v42, %v651_v26  ;;  %v2096_v28 = vcombine.low %v795_v61, %v798_v35  ;;  %v788_v53 = vsel %vm2580_vm2, %v2007_v25, %v787_v43  ;;  %v2989_v24 = vld [vmem:[%s2536_s9 + $0x50] sm:$0x1]  ;;  %v3004_v35 = vld [vmem:[%s2536_s9 + $0x54] sm:$0xf] }
  0x7f   : > { %v2087_v58 = vcombine.low %v642_v60, %v652_v21  ;;  %v789_v19 = vrot.slane %v787_v43, 4  ;;  %v961_v62 = vrot.slane %v959_v49, 4  ;;  %v964_v63 = vrot.slane %v962_v51, 5  ;;  %v3010_v21 = vld [vmem:[%s2536_s9 + $0x58] sm:$0xf] }
  0x80   : > { %1312 = vrot.lane.b32.xlu1 %v2088_v52, %s2434_s5  ;;  %v972_v2 = vshrl.u32 %v2949_v44, 16  ;;  %v2104_v4 = vcombine.low %v2932_v36, %v2949_v44  ;;  %v935_v54 = vshrl.u32 %v2019_v17, 16  ;;  %v938_v5 = vshll.u32 %v2019_v17, 16 }
  0x81   : > { %1310 = vrot.lane.b32.xlu0 %v2087_v58, %s2434_s5  ;;  %v791_v8 = vsel %vm2580_vm2, %v789_v19, %v790_v47  ;;  %v948_v10 = vshrl.u32 %v2959_v57, 16  ;;  %v2103_v50 = vcombine.low %v2019_v17, %v2959_v57  ;;  %v965_v11 = vor.u32 %v964_v63, %v961_v62  ;;  %v221_v62 = vld [vmem:[%s2536_s9 + $0x5c] sm:$0x1] }
  0x82   : > { %v2095_v12 = vcombine.low %v788_v53, %v791_v8  ;;  %v937_v56 = vrot.slane %v935_v54, 4  ;;  %v940_v14 = vrot.slane %v938_v5, 5  ;;  %v968_v1 = vshll.u32 %v2949_v44, 16 }
  0x83   : > { %v966_v18 = vrot.slane %v965_v11, 4  ;;  %v974_v16 = vrot.slane %v972_v2, 4  ;;  %v978_v20 = vshll.u32 %v2966_v6, 16  ;;  %v944_v13 = vshll.u32 %v2959_v57, 16 }
  0x84   : > { %1352 = vrot.lane.b32.xlu1 %v2096_v28, %s2431_s20  ;;  %v970_v27 = vrot.slane %v968_v1, 5  ;;  %v941_v7 = vor.u32 %v940_v14, %v937_v56  ;;  %v950_v9 = vrot.slane %v948_v10, 4  ;;  %v954_v32 = vshll.u32 %v2974_v46, 16 }
  0x85   : > { %1350 = vrot.lane.b32.xlu0 %v2095_v12, %s2431_s20  ;;  %v980_v22 = vrot.slane %v978_v20, 5  ;;  %v946_v23 = vrot.slane %v944_v13, 5  ;;  %v370_v29 = vshrl.u32 %v2978_v3, 16  ;;  %v373_v30 = vshll.u32 %v2978_v3, 16  ;;  %v424_v20 = vld [vmem:[%s2536_s9 + $0x54] sm:$0xe] }
  0x86   : > { %v971_v59 = vsel %vm2627_vm5, %v966_v18, %v970_v27  ;;  %v975_v26 = vor.u32 %v974_v16, %v970_v27  ;;  %v942_v45 = vrot.slane %v941_v7, 4  ;;  %v956_v31 = vrot.slane %v954_v32, 5  ;;  %v423_v32 = vld [vmem:[%s2536_s9 + $0x48] sm:$0xe] }
  0x87   : > { %v951_v34 = vor.u32 %v950_v9, %v946_v23  ;;  %v372_v25 = vrot.slane %v370_v29, 4  ;;  %v375_v36 = vrot.slane %v373_v30, 5  ;;  %v379_v38 = vshll.u32 %v2985_v40, 16 }
  0x88   : > { %1400 = vrot.lane.b32.xlu1 %v2104_v4, %s2430_s11  ;;  %v976_v41 = vrot.slane %v975_v26, 4  ;;  %v947_v61 = vsel %vm2627_vm5, %v942_v45, %v946_v23  ;;  %v383_v15 = vshrl.u32 %v2985_v40, 16  ;;  %v389_v60 = vshll.u32 %v2989_v24, 16 }
  0x89   : > { %1398 = vrot.lane.b32.xlu0 %v2103_v50, %s2430_s11  ;;  %v952_v42 = vrot.slane %v951_v34, 4  ;;  %v376_v43 = vor.u32 %v375_v36, %v372_v25  ;;  %v381_v47 = vrot.slane %v379_v38, 5  ;;  %v2047_v48 = vrot.slane %v2039_v33, 9  ;;  %v2040_v50 = vld [vmem:[%s2536_s9 + $0x54] sm:$0xe] }
  0x8a   : > { %v981_v49 = vsel %vm2627_vm5, %v976_v41, %v980_v22  ;;  %v385_v51 = vrot.slane %v383_v15, 4  ;;  %v391_v17 = vrot.slane %v389_v60, 5  ;;  %v1092_v52 = vrot.slane %v2959_v57, 5  ;;  %v3038_v33 = vld [vmem:[%s2536_s9 + $0x60] sm:$0xf] }
  0x8b   : > { %v2112_v28 = vcombine.low %v971_v59, %v981_v49  ;;  %v957_v53 = vsel %vm2627_vm5, %v952_v42, %v956_v31  ;;  %v377_v58 = vrot.slane %v376_v43, 4  ;;  %v1095_v19 = vrot.slane %v2974_v46, 5  ;;  %v1983_v49 = vld [vmem:[%s2536_s9 + $0x54] sm:$0xf] }
  0x8c   : > { %v2111_v63 = vcombine.low %v947_v61, %v957_v53  ;;  %v386_v2 = vor.u32 %v385_v51, %v381_v47  ;;  %v1093_v4 = vsel %vm2580_vm2, %v2047_v48, %v1092_v52  ;;  %v1094_v54 = vrot.slane %v1092_v52, 4  ;;  %v3063_v53 = vld [vmem:[%s2536_s9 + $0x58] sm:$0xf] }
  0x8d   : > { %1440 = vrot.lane.b32.xlu1 %v2112_v28, %s2435_s28  ;;  %v382_v57 = vsel %vm2627_vm5, %v377_v58, %v381_v47  ;;  %v394_v5 = vshrl.u32 %v3004_v35, 16  ;;  %v397_v8 = vshll.u32 %v3004_v35, 16  ;;  %v403_v10 = vshll.u32 %v3010_v21, 16  ;;  %v1986_v47 = vld [vmem:[%s2536_s9 + $0x64] sm:$0xf] }
  0x8e   : > { %1438 = vrot.lane.b32.xlu0 %v2111_v63, %s2435_s28  ;;  %v387_v11 = vrot.slane %v386_v2, 4  ;;  %v1096_v46 = vsel %vm2580_vm2, %v1094_v54, %v1095_v19  ;;  %v407_v12 = vshrl.u32 %v3010_v21, 16  ;;  %v413_v56 = vshll.u32 %v221_v62, 16 }
  0x8f   : > { %v2119_v14 = vcombine.low %v1093_v4, %v1096_v46  ;;  %v396_v1 = vrot.slane %v394_v5, 4  ;;  %v399_v18 = vrot.slane %v397_v8, 5  ;;  %v405_v16 = vrot.slane %v403_v10, 5  ;;  %v1994_v5 = vld [vmem:[%s2536_s9 + $0x68] sm:$0x1] }
  0x90   : > { %v392_v13 = vsel %vm2627_vm5, %v387_v11, %v391_v17  ;;  %v409_v27 = vrot.slane %v407_v12, 4  ;;  %v415_v7 = vrot.slane %v413_v56, 5  ;;  %v2048_v9 = vrot.slane %v2040_v50, 9  ;;  %v3079_v12 = vld [vmem:[%s2536_s9 + $0x5c] sm:$0x1] }
  0x91   : > { %v2065_v22 = vcombine.low %v382_v57, %v392_v13  ;;  %v400_v23 = vor.u32 %v399_v18, %v396_v1  ;;  %v1099_v29 = vrot.slane %v2949_v44, 5  ;;  %v1102_v30 = vrot.slane %v2966_v6, 5  ;;  %v3040_v34 = vpop.permute.xlu1 %1264 }
  0x92   : > { %1478 = vrot.lane.b32.xlu0 %v2119_v14, %s2436_s29  ;;  %v410_v59 = vor.u32 %v409_v27, %v405_v16  ;;  %v1970_v26 = vrot.slane %v424_v20, 9  ;;  %v503_v45 = vrot.slane %v3010_v21, 5  ;;  %v506_v31 = vrot.slane %v221_v62, 5  ;;  %v3065_v58 = vpop.permute.xlu0 %1262 }
  0x93   : > { %1186 = vrot.lane.b32.xlu1 %v2065_v22, %s2433_s24  ;;  %v401_v25 = vrot.slane %v400_v23, 4  ;;  %v1100_v44 = vsel %vm2580_vm2, %v2048_v9, %v1099_v29  ;;  %v1101_v6 = vrot.slane %v1099_v29, 4  ;;  %v1969_v36 = vrot.slane %v423_v32, 9  ;;  %v2001_v29 = vld [vmem:[%s2536_s9 + $0x54] sm:$0xe] }
  0x94   : > { %v411_v38 = vrot.slane %v410_v59, 4  ;;  %v504_v41 = vsel %vm2580_vm2, %v1970_v26, %v503_v45  ;;  %v505_v61 = vrot.slane %v503_v45, 4  ;;  %v496_v15 = vrot.slane %v2985_v40, 5 }
  0x95   : > { %v406_v60 = vsel %vm2627_vm5, %v401_v25, %v405_v16  ;;  %v1103_v42 = vsel %vm2580_vm2, %v1101_v6, %v1102_v30  ;;  %v499_v43 = vrot.slane %v2989_v24, 5  ;;  %v702_v48 = vshrl.u32 %v3038_v33, 16  ;;  %v3071_v8 = vpop.permute.xlu1 %1392  ;;  %v2002_v16 = vld [vmem:[%s2536_s9 + $0x60] sm:$0xe] }
  0x96   : > { %v416_v51 = vsel %vm2627_vm5, %v411_v38, %v415_v7  ;;  %v2120_v17 = vcombine.low %v1100_v44, %v1103_v42  ;;  %v507_v52 = vsel %vm2580_vm2, %v505_v61, %v506_v31  ;;  %v497_v28 = vsel %vm2580_vm2, %v1969_v36, %v496_v15 }
  0x97   : > { %v2066_v24 = vcombine.low %v406_v60, %v416_v51  ;;  %v2074_v19 = vcombine.low %v504_v41, %v507_v52  ;;  %v498_v62 = vrot.slane %v496_v15, 4  ;;  %v704_v63 = vrot.slane %v702_v48, 4  ;;  %v3086_v30 = vpop.permute.xlu0 %1390  ;;  %v3092_v60 = vld [vmem:[%s2536_s9 + $0x6c] sm:$0xf] }
  0x98   : > { %1480 = vrot.lane.b32.xlu0 %v2120_v17, %s2436_s29  ;;  %v705_v2 = vshll.u32 %v3038_v33, 16  ;;  %v715_v4 = vshrl.u32 %v1986_v47, 16  ;;  %v2082_v54 = vcombine.low %v3038_v33, %v1986_v47  ;;  %v678_v57 = vshrl.u32 %v1983_v49, 16 }
  0x99   : > { %1188 = vrot.lane.b32.xlu1 %v2066_v24, %s2433_s24  ;;  %v500_v10 = vsel %vm2580_vm2, %v498_v62, %v499_v43  ;;  %v681_v50 = vshll.u32 %v1983_v49, 16  ;;  %v691_v11 = vshrl.u32 %v3063_v53, 16  ;;  %v2081_v46 = vcombine.low %v1983_v49, %v3063_v53 }
  0x9a   : > { %v2073_v56 = vcombine.low %v497_v28, %v500_v10  ;;  %v707_v14 = vrot.slane %v705_v2, 5  ;;  %v680_v1 = vrot.slane %v678_v57, 4  ;;  %v711_v18 = vshll.u32 %v1986_v47, 16  ;;  %v2023_v2 = vld [vmem:[%s2536_s9 + $0x60] sm:$0xf] }
  0x9b   : > { %v683_v20 = vrot.slane %v681_v50, 5  ;;  %v717_v13 = vrot.slane %v715_v4, 4  ;;  %v721_v27 = vshll.u32 %v1994_v5, 16  ;;  %v687_v7 = vshll.u32 %v3063_v53, 16 }
  0x9c   : > { %1226 = vrot.lane.b32.xlu0 %v2073_v56, %s2432_s21  ;;  %v708_v9 = vor.u32 %v707_v14, %v704_v63  ;;  %v713_v32 = vrot.slane %v711_v18, 5  ;;  %v693_v22 = vrot.slane %v691_v11, 4  ;;  %v697_v23 = vshll.u32 %v3079_v12, 16 }
  0x9d   : > { %1228 = vrot.lane.b32.xlu1 %v2074_v19, %s2432_s21  ;;  %v723_v59 = vrot.slane %v721_v27, 5  ;;  %v684_v26 = vor.u32 %v683_v20, %v680_v1  ;;  %v689_v45 = vrot.slane %v687_v7, 5  ;;  %v2010_v31 = vrot.slane %v2002_v16, 9  ;;  %v2026_v19 = vld [vmem:[%s2536_s9 + $0x70] sm:$0xf]  ;;  %v3112_v4 = vpop.permute.xlu0 %1342  ;;  %s185_s21 = sand.u32 1, %s2403_s13  }
  0x9e   : > { %v709_v33 = vrot.slane %v708_v9, 4  ;;  %v718_v25 = vor.u32 %v717_v13, %v713_v32  ;;  %v699_v44 = vrot.slane %v697_v23, 5  ;;  %v808_v6 = vrot.slane %v1986_v47, 5  ;;  %v3089_v36 = vpop.permute.xlu1 %1214  ;;  %v2034_v16 = vld [vmem:[%s2536_s9 + $0x74] sm:$0x1]  ;;  %s1960_s24 = sshll.u32 %s185_s21, 4 }
  0x9f   : > { %v685_v38 = vrot.slane %v684_v26, 4  ;;  %v694_v41 = vor.u32 %v693_v22, %v689_v45  ;;  %v811_v61 = vrot.slane %v1994_v5, 5  ;;  %v2009_v15 = vrot.slane %v2001_v29, 9  ;;  %v3119_v5 = vld [vmem:[%s2536_s9 + $0x64] sm:$0xf]  ;;  %s187_s6 = scalar_lea.vmem [#allocation2], %s1960_s24 }
  0xa0   : > { %1274 = vrot.lane.b32.xlu0 %v2081_v46, %s2429_s10  ;;  %v714_v42 = vsel %vm2627_vm5, %v709_v33, %v713_v32  ;;  %v719_v43 = vrot.slane %v718_v25, 4  ;;  %v809_v48 = vsel %vm2580_vm2, %v2010_v31, %v808_v6  ;;  %v810_v47 = vrot.slane %v808_v6, 4  ;;  %v2033_v9 = vld [vmem:[%s2536_s9 + $0x68] sm:$0x1]  ;;  %s1878_s7 = sshll.u32 %s187_s6, 4  ;;  %s3273_s7 = int_to_ptr.vmem [resolvable:$true] %s1878_s7 }
  0xa1   : > { %1276 = vrot.lane.b32.xlu1 %v2082_v54, %s2429_s10  ;;  %v690_v49 = vsel %vm2627_vm5, %v685_v38, %v689_v45  ;;  %v695_v51 = vrot.slane %v694_v41, 4  ;;  %v801_v17 = vrot.slane %v3063_v53, 5  ;;  %v804_v52 = vrot.slane %v3079_v12, 5  ;;  %s2333_s10 = scalar_lea.vmem %s3273_s7, 256 }
  0xa2   : > { %v724_v28 = vsel %vm2627_vm5, %v719_v43, %v723_v59  ;;  %v812_v24 = vsel %vm2580_vm2, %v810_v47, %v811_v61  ;;  %v1007_v62 = vshrl.u32 %v3092_v60, 16  ;;  %v1010_v63 = vshll.u32 %v3092_v60, 16  ;;  %v3121_v10 = vpop.permute.xlu1 %1216  ;;  %v2042_v59 = vld [vmem:[%s2536_s9 + $0x6c] sm:$0xe]  ;;  %p2334_p13 = scmp.ne.s32.totalorder %s3273_s7, %s2333_s10 }
  0xa3   : > { %v2090_v54 = vcombine.low %v714_v42, %v724_v28  ;;  %v700_v53 = vsel %vm2627_vm5, %v695_v51, %v699_v44  ;;  %v802_v57 = vsel %vm2580_vm2, %v2009_v15, %v801_v17  ;;  %v803_v11 = vrot.slane %v801_v17, 4 }
  0xa4   : > { %v2089_v50 = vcombine.low %v690_v49, %v700_v53  ;;  %v1009_v46 = vrot.slane %v1007_v62, 4  ;;  %v1012_v12 = vrot.slane %v1010_v63, 5  ;;  %v2098_v56 = vcombine.low %v809_v48, %v812_v24  ;;  %v2041_v48 = vld [vmem:[%s2536_s9 + $0x60] sm:$0xe]  ;;  %p2335_p0 = pnand %p2334_p13, %p2511_p3 }
  0xa5   : > { %1316 = vrot.lane.b32.xlu1 %v2090_v54, %s2434_s5  ;;  %v1020_v14 = vshrl.u32 %v2026_v19, 16  ;;  %v983_v1 = vshrl.u32 %v2023_v2, 16  ;;  %v986_v18 = vshll.u32 %v2023_v2, 16  ;;  %v805_v20 = vsel %vm2580_vm2, %v803_v11, %v804_v52 }
  0xa6   : > { %1314 = vrot.lane.b32.xlu0 %v2089_v50, %s2434_s5  ;;  %v2106_v13 = vcombine.low %v3092_v60, %v2026_v19  ;;  %v996_v27 = vshrl.u32 %v3119_v5, 16  ;;  %v1013_v7 = vor.u32 %v1012_v12, %v1009_v46  ;;  %v2097_v32 = vcombine.low %v802_v57, %v805_v20  ;;  %v3134_v61 = vpop.permute.xlu1 %1344  ;;  %v2323_v46 = vld [vmem:[%s2536_s9 + $0x4] sm:$0xf]  ;;  %v2324_v12 = vld [vmem:[%s2536_s9] sm:$0xf]  ;;  %s1875_s5 = sadd.s32 %s2411_s15, %s2142_s4  ;;  %s3280_s15 = scalar_lea.sflag [#allocation3], %s185_s21 }
  0xa7   : > { %v985_v22 = vrot.slane %v983_v1, 4  ;;  %v988_v23 = vrot.slane %v986_v18, 5  ;;  %v1016_v29 = vshll.u32 %v2026_v19, 16  ;;  %v1022_v45 = vrot.slane %v1020_v14, 4  ;;  %s2143_s8 = sshll.u32 %s1875_s5, 6  ;;  %p2336_p1 = pneg %p2335_p0 }
  0xa8   : > { %v1014_v26 = vrot.slane %v1013_v7, 4  ;;  %v1026_v31 = vshll.u32 %v2034_v16, 16  ;;  %v992_v33 = vshll.u32 %v3119_v5, 16  ;;  %v1175_v25 = vpop.permute.xlu0 %1174  ;;  %v998_v38 = vrot.slane %v996_v27, 4  ;;  %s3278_s16 = scalar_lea.hbm %s3336_s3, %s2143_s8 }
  0xa9   : > { %1356 = vrot.lane.b32.xlu1 %v2098_v56, %s2431_s20  ;;  %v1018_v44 = vrot.slane %v1016_v29, 5  ;;  %v989_v6 = vor.u32 %v988_v23, %v985_v22  ;;  %v1002_v41 = vshll.u32 %v2033_v9, 16  ;;  %v2105_v15 = vcombine.low %v2023_v2, %v3119_v5  ;;  %v2326_v22 = vld [vmem:[%s2536_s9 + $0xc] sm:$0xf] }
  0xaa   : > { %1354 = vrot.lane.b32.xlu0 %v2097_v32, %s2431_s20  ;;  %v994_v60 = vrot.slane %v992_v33, 5  ;;  %v2050_v42 = vrot.slane %v2042_v59, 9  ;;  %v1113_v43 = vrot.slane %v2026_v19, 5  ;;  %v1028_v51 = vrot.slane %v1026_v31, 5  ;;  %v2325_v32 = vld [vmem:[%s2536_s9 + $0x10] sm:$0xf] }
  0xab   : > { %v1019_v47 = vsel %vm2627_vm5, %v1014_v26, %v1018_v44  ;;  %v1023_v49 = vor.u32 %v1022_v45, %v1018_v44  ;;  %v990_v17 = vrot.slane %v989_v6, 4  ;;  %v1004_v28 = vrot.slane %v1002_v41, 5 }
  0xac   : > { %v999_v52 = vor.u32 %v998_v38, %v994_v60  ;;  %v1115_v24 = vrot.slane %v1113_v43, 4  ;;  %v1116_v62 = vrot.slane %v2034_v16, 5  ;;  %v1177_v63 = vpop.permute.xlu0 %1176  ;;  %v1114_v19 = vsel %vm2580_vm2, %v2050_v42, %v1113_v43 }
  0xad   : > { %1404 = vrot.lane.b32.xlu1 %v2106_v13, %s2430_s11  ;;  %v1024_v2 = vrot.slane %v1023_v49, 4  ;;  %v2049_v54 = vrot.slane %v2041_v48, 9  ;;  %v1106_v53 = vrot.slane %v3119_v5, 5  ;;  %v995_v57 = vsel %vm2627_vm5, %v990_v17, %v994_v60  ;;  %v1305_v16 = vpop.permute.xlu1 %1304 }
  0xae   : > { %1402 = vrot.lane.b32.xlu0 %v2105_v15, %s2430_s11  ;;  %v1000_v50 = vrot.slane %v999_v52, 4  ;;  %v1109_v11 = vrot.slane %v2033_v9, 5  ;;  %v2051_v56 = vcombine.low %v2324_v12, %v2323_v46  ;;  %v1117_v1 = vsel %vm2580_vm2, %v1115_v24, %v1116_v62  ;;  %s2437_s11 = smov [#allocation2]  }
  0xaf   : > { %v1029_v14 = vsel %vm2627_vm5, %v1024_v2, %v1028_v51  ;;  %v1107_v5 = vsel %vm2580_vm2, %v2049_v54, %v1106_v53  ;;  %v1108_v18 = vrot.slane %v1106_v53, 4  ;;  %v2052_v23 = vcombine.low %v2326_v22, %v2325_v32  ;;  %v2328_v54 = vld [vmem:[%s2536_s9 + $0x1c] sm:$0xf] }
  0xb0   : > { %v2114_v20 = vcombine.low %v1019_v47, %v1029_v14  ;;  %v1005_v13 = vsel %vm2627_vm5, %v1000_v50, %v1004_v28  ;;  %v1489_v9 = vsel %vm1486_vm6, %v2051_v56, %v1175_v25  ;;  %v1303_v29 = vpop.permute.xlu0 %1302  ;;  %v2122_v59 = vcombine.low %v1114_v19, %v1117_v1  ;;  %v2327_v19 = vld [vmem:[%s2536_s9 + $0x18] sm:$0xf]  ;;  %v2329_v56 = vld [vmem:[%s2536_s9 + $0x24] sm:$0xf]  ;;  %v2330_v14 = vld [vmem:[%s2536_s9 + $0x28] sm:$0xf] }
  0xb1   : > { %v2113_v27 = vcombine.low %v995_v57, %v1005_v13  ;;  %v1110_v7 = vsel %vm2580_vm2, %v1108_v18, %v1109_v11  ;;  %v1513_v26 = vsel %vm1511_vm7, %v1489_v9, %v3089_v36  ;;  %v1492_v45 = vsel %vm1486_vm6, %v2052_v23, %v1177_v63 }
  0xb2   : > { %1444 = vrot.lane.b32.xlu1 %v2114_v20, %s2435_s28  ;;  %v2121_v37 = vcombine.low %v1107_v5, %v1110_v7  ;;  %v1530_v31 = vsel %vm1528_vm8, %v1513_v26, %v3065_v58  ;;  %v1515_v33 = vsel %vm1511_vm7, %v1492_v45, %v3121_v10  ;;  %v1692_v38 = vsel %vm1690_vm12, %v2317_v39, 0 }
  0xb3   : > { %1442 = vrot.lane.b32.xlu0 %v2113_v27, %s2435_s28  ;;  %v1547_v36 = vsel %vm1545_vm9, %v1530_v31, %v1303_v29  ;;  %v1532_v25 = vsel %vm1528_vm8, %v1515_v33, %v3040_v34  ;;  %v1433_v6 = vpop.permute.xlu1 %1432  ;;  %2183 = vmatpush3.bf16.msra.mxu0 %v1692_v38  ;;  %v2058_v41 = vcombine.low %v3004_v35, %v3010_v21 }
  0xb4   : > { %v1564_v44 = vsel %vm1562_vm10, %v1547_v36, %v3112_v4  ;;  %v1549_v58 = vsel %vm1545_vm9, %v1532_v25, %v1305_v16  ;;  %v2057_v4 = vcombine.low %v2978_v3, %v2985_v40  ;;  %2209 = vmatpush3.bf16.msra.mxu1 %v1692_v38  ;;  %v2053_v53 = vcombine.low %v2327_v19, %v2328_v54 }
  0xb5   : > { %v1581_v34 = vsel %vm1579_vm11, %v1564_v44, %v3086_v30  ;;  %v1566_v15 = vsel %vm1562_vm10, %v1549_v58, %v3134_v61  ;;  %v2054_v1 = vcombine.low %v2329_v56, %v2330_v14 }
  0xb6   : > { %1484 = vrot.lane.b32.xlu1 %v2122_v59, %s2436_s29  ;;  %v1583_v30 = vsel %vm1579_vm11, %v1566_v15, %v3071_v8  ;;  %v2331_v15 = vld [vmem:[%s2536_s9 + $0x30] sm:$0xf] }
  0xb7   : > { %1482 = vrot.lane.b32.xlu0 %v2121_v37, %s2436_s29  ;;  %v1431_v10 = vpop.permute.xlu0 %1430  ;;  %v1600_v47 = vsel %vm1596_vm13, %v1583_v30, %v1433_v6 }
  0xb8   : > { %v1598_v60 = vsel %vm1596_vm13, %v1581_v34, %v1431_v10 }
  0xba   : > { %v1179_v42 = vpop.permute.xlu1 %1178 }
  0xbb   : > { %v1471_v43 = vpop.permute.xlu0 %1470  ;;  %v1495_v11 = vsel %vm1486_vm6, %v2053_v53, %v1179_v42 }
  0xbc   : > { %v1615_v48 = vsel %vm1613_vm14, %v1598_v60, %v1471_v43  ;;  %v2332_v60 = vld [vmem:[%s2536_s9 + $0x34] sm:$0xf]  ;;  %s2337_s9 = sshll.u32 %s2437_s11, 4  ;;  %s2338_s9 = int_to_ptr.vmem [resolvable:$false] %s2337_s9 }
  0xbd   : > { %2184 = vmatprep.mubr.msk.bf16.mxu0 %vm1673_vm15, %v1615_v48  ;;  %v2055_v42 = vcombine.low %v2331_v15, %v2332_v60  ;;  %s2339_s20 = scalar_lea.vmem %s2338_s9, 512  ;;  %p2340_p2 = scmp.lt.s32.totalorder %s3273_s7, %s2338_s9 }
  0xbe   : > { %p2341_p4 = scmp.lt.s32.totalorder %s2339_s20, %s2333_s10 }
  0xc0   : > { %v1473_v49 = vpop.permute.xlu0 %1472  ;;  %p2342_p5 = por %p2341_p4, %p2340_p2 }
  0xc1   : > { %v1181_v51 = vpop.permute.xlu1 %1180  ;;  %v1617_v61 = vsel %vm1613_vm14, %v1600_v47, %v1473_v49 }
  0xc2   : > { %2185 = vmatmul.mubr.msk.bf16.vlgmr.msra.gmra.mrb[0].mxu0 %vm1673_vm15, %v1617_v61  ;;  %v1498_v27 = vsel %vm1486_vm6, %v2054_v1, %v1181_v51  ;;  %v2056_v51 = vcombine.low %v2854_v55, %v2860_v0  ;;  %p2343_p6 = pnand %p2342_p5, %p2336_p1 }
  0xc4   : > { %v1219_v17 = vpop.permute.xlu0 %1218 }
  0xc5   : > { %v1221_v52 = vpop.permute.xlu1 %1220  ;;  %v1517_v46 = vsel %vm1511_vm7, %v1495_v11, %v1219_v17 }
  0xc6   : > { %v1519_v32 = vsel %vm1511_vm7, %v1498_v27, %v1221_v52 }
  0xc8   : > { %v1267_v28 = vpop.permute.xlu0 %1266 }
  0xc9   : > { %v1269_v24 = vpop.permute.xlu1 %1268  ;;  %v1534_v5 = vsel %vm1528_vm8, %v1517_v46, %v1267_v28 }
  0xca   : > { %v1536_v29 = vsel %vm1528_vm8, %v1519_v32, %v1269_v24 }
  0xcd   : > { %v1309_v62 = vpop.permute.xlu1 %1308 }
  0xce   : > { %v1307_v63 = vpop.permute.xlu0 %1306  ;;  %v1553_v59 = vsel %vm1545_vm9, %v1536_v29, %v1309_v62 }
  0xcf   : > { %v1551_v16 = vsel %vm1545_vm9, %v1534_v5, %v1307_v63 }
  0xd1   : > { %v1349_v8 = vpop.permute.xlu1 %1348 }
  0xd2   : > { %v1347_v2 = vpop.permute.xlu0 %1346  ;;  %v1570_v26 = vsel %vm1562_vm10, %v1553_v59, %v1349_v8 }
  0xd3   : > { %v1568_v20 = vsel %vm1562_vm10, %v1551_v16, %v1347_v2 }
  0xd5   : > { %v1397_v57 = vpop.permute.xlu1 %1396 }
  0xd6   : > { %v1395_v50 = vpop.permute.xlu0 %1394  ;;  %v1587_v39 = vsel %vm1579_vm11, %v1570_v26, %v1397_v57 }
  0xd7   : > { %v1585_v13 = vsel %vm1579_vm11, %v1568_v20, %v1395_v50 }
  0xda   : > { %v1437_v12 = vpop.permute.xlu1 %1436 }
  0xdb   : > { %v1435_v18 = vpop.permute.xlu0 %1434  ;;  %v1604_v37 = vsel %vm1596_vm13, %v1587_v39, %v1437_v12 }
  0xdc   : > { %v1602_v7 = vsel %vm1596_vm13, %v1585_v13, %v1435_v18 }
  0xdf   : > { %v1475_v9 = vpop.permute.xlu0 %1474 }
  0xe0   : > { %v1183_v22 = vpop.permute.xlu1 %1182  ;;  %v1619_v23 = vsel %vm1613_vm14, %v1602_v7, %v1475_v9 }
  0xe1   : > { %2188 = vmatprep.mubr.msk.bf16.mxu0 %vm1673_vm15, %v1619_v23  ;;  %v1501_v30 = vsel %vm1486_vm6, %v2055_v42, %v1183_v22 }
  0xe5   : > { %v1477_v45 = vpop.permute.xlu0 %1476 }
  0xe6   : > { %v1185_v31 = vpop.permute.xlu1 %1184  ;;  %v1621_v33 = vsel %vm1613_vm14, %v1604_v37, %v1477_v45 }
  0xe7   : > { %2189 = vmatmul.mubr.msk.bf16.gmra.mrb[4].mxu0 %vm1673_vm15, %v1621_v33  ;;  %v1504_v62 = vsel %vm1486_vm6, %v2056_v51, %v1185_v31 }
  0xe9   : > { %v1223_v36 = vpop.permute.xlu0 %1222 }
  0xea   : > { %v1225_v25 = vpop.permute.xlu1 %1224  ;;  %v1521_v47 = vsel %vm1511_vm7, %v1501_v30, %v1223_v36 }
  0xeb   : > { %v1523_v2 = vsel %vm1511_vm7, %v1504_v62, %v1225_v25 }
  0xed   : > { %v1271_v44 = vpop.permute.xlu0 %1270 }
  0xee   : > { %v1273_v6 = vpop.permute.xlu1 %1272  ;;  %v1538_v61 = vsel %vm1528_vm8, %v1521_v47, %v1271_v44  ;;  %v2123_v44 = vld [vmem:[%s3335_s2] ss:$0 sm:$0xff] }
  0xef   : > { %v1540_v55 = vsel %vm1528_vm8, %v1523_v2, %v1273_v6 }
  0xf2   : > { %v1313_v38 = vpop.permute.xlu1 %1312 }
  0xf3   : > { %v1311_v58 = vpop.permute.xlu0 %1310  ;;  %v1557_v0 = vsel %vm1545_vm9, %v1540_v55, %v1313_v38 }
  0xf4   : > { %v1555_v52 = vsel %vm1545_vm9, %v1538_v61, %v1311_v58 }
  0xf6   : > { %v1353_v10 = vpop.permute.xlu1 %1352 }
  0xf7   : > { %v1351_v34 = vpop.permute.xlu0 %1350  ;;  %v1574_v53 = vsel %vm1562_vm10, %v1557_v0, %v1353_v10 }
  0xf8   : > { %v1572_v28 = vsel %vm1562_vm10, %v1555_v52, %v1351_v34 }
  0xfa   : > { %v1401_v43 = vpop.permute.xlu1 %1400 }
  0xfb   : > { %v1399_v48 = vpop.permute.xlu0 %1398  ;;  %v1591_v57 = vsel %vm1579_vm11, %v1574_v53, %v1401_v43 }
  0xfc   : > { %v1589_v24 = vsel %vm1579_vm11, %v1572_v28, %v1399_v48 }
  0xff   : > { %v1441_v49 = vpop.permute.xlu1 %1440 }
 0x100   : > { %v1439_v17 = vpop.permute.xlu0 %1438  ;;  %v1608_v50 = vsel %vm1596_vm13, %v1591_v57, %v1441_v49 }
 0x101   : > { %v1606_v63 = vsel %vm1596_vm13, %v1589_v24, %v1439_v17 }
 0x104   : > { %v1479_v8 = vpop.permute.xlu0 %1478 }
 0x105   : > { %v1187_v19 = vpop.permute.xlu1 %1186  ;;  %v1623_v54 = vsel %vm1613_vm14, %v1606_v63, %v1479_v8 }
 0x106   : > { %2192 = vmatprep.mubr.msk.bf16.mxu1 %vm1673_vm15, %v1623_v54  ;;  %v1507_v32 = vsel %vm1486_vm6, %v2057_v4, %v1187_v19 }
 0x10a   : > { %v1481_v11 = vpop.permute.xlu0 %1480 }
 0x10b   : > { %v1189_v46 = vpop.permute.xlu1 %1188  ;;  %v1625_v12 = vsel %vm1613_vm14, %v1608_v50, %v1481_v11 }
 0x10c   : > { %2193 = vmatmul.mubr.msk.bf16.vlgmr.msra.gmra.mrb[0].mxu1 %vm1673_vm15, %v1625_v12  ;;  %v1510_v9 = vsel %vm1486_vm6, %v2058_v41, %v1189_v46 }
 0x10e   : > { %v1227_v56 = vpop.permute.xlu0 %1226 }
 0x10f   : > { %v1229_v14 = vpop.permute.xlu1 %1228  ;;  %v1525_v23 = vsel %vm1511_vm7, %v1507_v32, %v1227_v56 }
 0x110   : > { %v1527_v22 = vsel %vm1511_vm7, %v1510_v9, %v1229_v14 }
 0x112   : > { %v1275_v1 = vpop.permute.xlu0 %1274 }
 0x113   : > { %v1277_v5 = vpop.permute.xlu1 %1276  ;;  %v1542_v26 = vsel %vm1528_vm8, %v1525_v23, %v1275_v1 }
 0x114   : > { %v1544_v29 = vsel %vm1528_vm8, %v1527_v22, %v1277_v5 }
 0x117   : > { %v1317_v18 = vpop.permute.xlu1 %1316 }
 0x118   : > { %v1315_v16 = vpop.permute.xlu0 %1314  ;;  %v1561_v39 = vsel %vm1545_vm9, %v1544_v29, %v1317_v18 }
 0x119   : > { %v1559_v35 = vsel %vm1545_vm9, %v1542_v26, %v1315_v16 }
 0x11b   : > { %v1357_v20 = vpop.permute.xlu1 %1356 }
 0x11c   : > { %v1355_v13 = vpop.permute.xlu0 %1354  ;;  %v1578_v21 = vsel %vm1562_vm10, %v1561_v39, %v1357_v20 }
 0x11d   : > { %v1576_v3 = vsel %vm1562_vm10, %v1559_v35, %v1355_v13 }
 0x11f   : > { %v1405_v27 = vpop.permute.xlu1 %1404 }
 0x120   : > { %v1403_v7 = vpop.permute.xlu0 %1402  ;;  %v1595_v40 = vsel %vm1579_vm11, %v1578_v21, %v1405_v27 }
 0x121   : > { %v1593_v4 = vsel %vm1579_vm11, %v1576_v3, %v1403_v7 }
 0x124   : > { %v1445_v59 = vpop.permute.xlu1 %1444 }
 0x125   : > { %v1443_v37 = vpop.permute.xlu0 %1442  ;;  %v1612_v41 = vsel %vm1596_vm13, %v1595_v40, %v1445_v59 }
 0x126   : > { %v1610_v31 = vsel %vm1596_vm13, %v1593_v4, %v1443_v37 }
 0x128   : > { %v1485_v45 = vpop.permute.xlu1 %1484 }
 0x129   : > { %v1629_v33 = vsel %vm1613_vm14, %v1612_v41, %v1485_v45  ;;  %v1483_v36 = vpop.permute.xlu0 %1482 }
 0x12a   : > { %v1627_v25 = vsel %vm1613_vm14, %v1610_v31, %v1483_v36 }
 0x12b   : > { %2196 = vmatprep.mubr.msk.bf16.mxu1 %vm1673_vm15, %v1627_v25 }
 0x12c   : > { %2197 = vmatmul.mubr.msk.bf16.gmra.mrb[4].mxu1 %vm1673_vm15, %v1629_v33 }
 0x195   : > { %v2186_v6 = vpop.f32.mrb[0].mxu0 }
 0x196   : > { %v1728_v38 = vpop.f32.mrb[1].mxu0  ;;  %v1737_v42 = vadd.f32 %v2186_v6, %v2123_v44 }
 0x197   : > { %v1729_v58 = vadd.f32 %v2123_v44, %v1728_v38  ;;  %v2187_v10 = vpop.f32.mrb[2].mxu0 }
 0x198   : > { %v1731_v34 = vpop.f32.mrb[3].mxu0  ;;  %v1793_v48 = vmax.f32 %v1737_v42, 0.0  ;;  %v1740_v30 = vadd.f32 %v2187_v10, %v2123_v44 }
 0x199   : > { %v1791_v15 = vmax.f32 %v1729_v58, 0.0  ;;  %v1732_v60 = vadd.f32 %v2123_v44, %v1731_v34 }
 0x19a   : > { %v1794_v47 = vmax.f32 %v1740_v30, 0.0 }
 0x19b   : > { %1807 = vxpose.xlu0.b32.start [1/16] (narrow) %v1791_v15, 64  ;;  %v1792_v43 = vmax.f32 %v1732_v60, 0.0 }
 0x19f   : > { %1808 = vxpose.xlu0.b32.cont [2/16] (narrow) %v1792_v43, 64 }
 0x1a3   : > { %1809 = vxpose.xlu0.b32.cont [3/16] (narrow) %v1793_v48, 64 }
 0x1a7   : > { %1810 = vxpose.xlu0.b32.cont [4/16] (narrow) %v1794_v47, 64 }
 0x1ba   : > { %v2190_v49 = vpop.f32.mrb[4].mxu0 }
 0x1bb   : > { %v1744_v51 = vpop.f32.mrb[5].mxu0  ;;  %v1753_v62 = vadd.f32 %v2190_v49, %v2123_v44 }
 0x1bc   : > { %v1745_v61 = vadd.f32 %v2123_v44, %v1744_v51  ;;  %v2191_v17 = vpop.f32.mrb[6].mxu0 }
 0x1bd   : > { %v1747_v52 = vpop.f32.mrb[7].mxu0  ;;  %v1797_v8 = vmax.f32 %v1753_v62, 0.0  ;;  %v1756_v2 = vadd.f32 %v2191_v17, %v2123_v44 }
 0x1be   : > { %v1795_v28 = vmax.f32 %v1745_v61, 0.0  ;;  %v1748_v24 = vadd.f32 %v2123_v44, %v1747_v52 }
 0x1bf   : > { %v1798_v19 = vmax.f32 %v1756_v2, 0.0 }
 0x1c0   : > { %1811 = vxpose.xlu0.b32.cont [5/16] (narrow) %v1795_v28, 64  ;;  %v1796_v63 = vmax.f32 %v1748_v24, 0.0 }
 0x1c4   : > { %1812 = vxpose.xlu0.b32.cont [6/16] (narrow) %v1796_v63, 64 }
 0x1c8   : > { %1813 = vxpose.xlu0.b32.cont [7/16] (narrow) %v1797_v8, 64 }
 0x1cc   : > { %1814 = vxpose.xlu0.b32.cont [8/16] (narrow) %v1798_v19, 64 }
 0x1df   : > { %v2194_v54 = vpop.f32.mrb[0].mxu1 }
 0x1e0   : > { %v1760_v55 = vpop.f32.mrb[1].mxu1  ;;  %v1769_v46 = vadd.f32 %v2194_v54, %v2123_v44 }
 0x1e1   : > { %v1761_v0 = vadd.f32 %v2123_v44, %v1760_v55  ;;  %v2195_v53 = vpop.f32.mrb[2].mxu1 }
 0x1e2   : > { %v1763_v57 = vpop.f32.mrb[3].mxu1  ;;  %v1801_v56 = vmax.f32 %v1769_v46, 0.0  ;;  %v1772_v14 = vadd.f32 %v2195_v53, %v2123_v44 }
 0x1e3   : > { %v1799_v50 = vmax.f32 %v1761_v0, 0.0  ;;  %v1764_v11 = vadd.f32 %v2123_v44, %v1763_v57 }
 0x1e4   : > { %v1802_v1 = vmax.f32 %v1772_v14, 0.0 }
 0x1e5   : > { %1815 = vxpose.xlu0.b32.cont [9/16] (narrow) %v1799_v50, 64  ;;  %v1800_v12 = vmax.f32 %v1764_v11, 0.0 }
 0x1e9   : > { %1816 = vxpose.xlu0.b32.cont [10/16] (narrow) %v1800_v12, 64 }
 0x1ed   : > { %1817 = vxpose.xlu0.b32.cont [11/16] (narrow) %v1801_v56, 64 }
 0x1f1   : > { %1818 = vxpose.xlu0.b32.cont [12/16] (narrow) %v1802_v1, 64 }
 0x1ff   : > { %v2198_v5 = vpop.f32.mrb[4].mxu1 }
 0x200   : > { %v1776_v18 = vpop.f32.mrb[5].mxu1  ;;  %v1785_v9 = vadd.f32 %v2198_v5, %v2123_v44 }
 0x201   : > { %v1777_v16 = vadd.f32 %v2123_v44, %v1776_v18  ;;  %v2199_v20 = vpop.f32.mrb[6].mxu1 }
 0x202   : > { %v1779_v13 = vpop.f32.mrb[7].mxu1  ;;  %v1805_v22 = vmax.f32 %v1785_v9, 0.0  ;;  %v1788_v23 = vadd.f32 %v2199_v20, %v2123_v44 }
 0x203   : > { %v1803_v27 = vmax.f32 %v1777_v16, 0.0  ;;  %v1780_v7 = vadd.f32 %v2123_v44, %v1779_v13 }
 0x204   : > { %v1806_v29 = vmax.f32 %v1788_v23, 0.0 }
 0x205   : > { %1819 = vxpose.xlu0.b32.cont [13/16] (narrow) %v1803_v27, 64  ;;  %v1804_v32 = vmax.f32 %v1780_v7, 0.0 }
 0x209   : > { %1820 = vxpose.xlu0.b32.cont [14/16] (narrow) %v1804_v32, 64 }
 0x20d   : > { %1821 = vxpose.xlu0.b32.cont [15/16] (narrow) %v1805_v22, 64 }
 0x211   : > { %1822 = vxpose.xlu0.b32.end [16/16] (narrow) %v1806_v29, 64 }
 0x255   : > { %v1823_v59 = vpop.trf.xlu0 }
 0x259   : > { %v1824_v26 = vpop.trf.xlu0 }
 0x25d   : > { %v1825_v39 = vpop.trf.xlu0 }
 0x261   : > { %v1826_v37 = vpop.trf.xlu0 }
 0x265   : > { %v1827_v35 = vpop.trf.xlu0 }
 0x266   : > { %v1839_v3 = vmul.f32 %v1827_v35, %v1823_v59 }
 0x269   : > { %v1828_v21 = vpop.trf.xlu0 }
 0x26a   : > { %v1840_v40 = vmul.f32 %v1828_v21, %v1824_v26 }
 0x26c   : > { %v2153_v4 = vpack.c.bf16 %v1840_v40, %v1839_v3 }
 0x26d   : > { %v1829_v41 = vpop.trf.xlu0 }
 0x26e   : > { %2154 = vst [vmem:[%s187_s6] sm:$0xff] %v2153_v4   ;;  %v1841_v31 = vmul.f32 %v1829_v41, %v1825_v39 }
 0x271   : > { %v1830_v45 = vpop.trf.xlu0 }
 0x272   : > { %v1842_v33 = vmul.f32 %v1830_v45, %v1826_v37 }
 0x274   : > { %v2158_v36 = vpack.c.bf16 %v1842_v33, %v1841_v31 }
 0x276   : > { %2160 = vst [vmem:[%s187_s6 + $0x8] sm:$0xff] %v2158_v36  }
 0x277   : > { %2346 = shalt.err (!%p2343_p6)
}
 0x278   : > { %s2347_s21 = scalar_lea.hbm %s3278_s16, 256  ;;  %s2351_s5 = scalar_lea.hbm %s3336_s3, 1024 }
 0x279   : > { %p2348_p7 = scmp.ne.s32.totalorder %s3278_s16, %s2347_s21  ;;  %p2352_p11 = scmp.lt.u32.totalorder %s3278_s16, %s3336_s3 }
 0x27a   : > { %p2353_p12 = scmp.lt.u32.totalorder %s2351_s5, %s2347_s21  ;;  %p2355_p0 = scmp.lt.u32.totalorder %s2347_s21, %s3278_s16 }
 0x27b   : > { %p2349_p9 = pnand %p2348_p7, %p2511_p3 }
 0x27c   : > { %p2354_p13 = por %p2353_p12, %p2352_p11 }
 0x27d   : > { %p2350_p10 = pneg %p2349_p9 }
 0x27e   : > { %p2356_p1 = por %p2355_p0, %p2354_p13 }
 0x280   : > { %p2357_p2 = pnand %p2356_p1, %p2350_p10 }
 0x282   : > { %2360 = shalt.err (!%p2357_p2)
}
 0x283   : > { %s2438_s27 = smov 128   ;;  %s2439_s28 = smov 4  }
 0x284   : > { %2213 = dma.vmem_to_hbm [thread:$0]  (%p2511_p3), %s3273_s7, 256, %s3278_s16, %s3280_s15, %s2436_s29, %s2438_s27, %s2439_s28  }
 0x285 PF: > { %p2219_p4 = scmp.ge.s32.totalorder %s2427_s19, 2  ;;  %s1893_s10 = sand.u32 1, %s2399_s12  }
 0x286   : > { %s1894_s11 = scalar_lea.sflag [#allocation3], %s1893_s10 }
 0x287   : > { %p2216_p5 = pnand %p2219_p4, %p2520_p8 }
 0x289   : > { %2394 = dma.done.wait (!%p2216_p5), %s1894_s11, 256  }
 0x28a   : > { %2396 = vsyncadd (!%p2216_p5), %s1894_s11, 4294967040  ;;  %s16_s19 = sadd.s32 1, %s2427_s19   ;;  %s3343_s12 = smov %s2403_s13 }
 0x28b   : > { %p13_p6 = scmp.ge.s32.totalorder %s16_s19, 6   ;;  %s3344_s13 = smov %s2407_s14 }
 0x28c   : > { %s3345_s14 = smov %s2529_s30  ;;  %s3346_s15 = smov %s2419_s17 }
 0x28d   : > { %s3347_s16 = smov %s2423_s18  ;;  %s3348_s17 = smov %s3351_s22 }
 0x28e   : > { %s3349_s18 = smov %s3355_s23  ;;  %15 = sbr.rel (!%p13_p6) target bundleno = 5 (0x5), region = 69 }
 0x295   :  { %1899 = vsyncpa [#allocation3], 1 }
 0x296   :  { %1901 = vsyncpa [#allocation3 + $0x1], 1 }

</bundles_post_ra>
